<compile_context>
chip_gen: v6e
topology: v6e:2x2x1
jax: 0.10.0
libtpu: 0.0.40
codegen_flags: <defaults>
</compile_context>

<pallas_src>
import functools
import math

import jax
import jax.numpy as jnp
import numpy as np
from jax.experimental import pallas as pl
from jax.experimental.pallas import tpu as pltpu


def bilstm_attn_kernel(idx_ref, emb_ref, wih_ref, bih_ref,
                       whh_f_ref, whh_r_ref, w_out_ref, b_out_ref,
                       logits_ref, *, S, B, BP):
    H = whh_f_ref.shape[0]
    V = emb_ref.shape[0]
    H4 = 4 * H

    # ---- in-kernel embedding gather (one-hot selection on the MXU) ----
    # idx row s*BP+b holds token X[b, s]; padded batch rows hold -1 -> all-zero one-hot
    # -> zero embedding row (finite everywhere, results discarded at the end).
    idx = idx_ref[...]                                                        # (S*BP, 1)
    vocab = jax.lax.broadcasted_iota(jnp.int32, (S * BP, V), 1)
    onehot = (idx == vocab).astype(jnp.float32)                               # (S*BP, V)
    x2d = jnp.dot(onehot, emb_ref[...], preferred_element_type=jnp.float32)   # (S*BP, E)

    # ---- fused input projection: both directions, all timesteps, one matmul ----
    xp = jnp.dot(x2d, wih_ref[...], preferred_element_type=jnp.float32) + bih_ref[...]
    xp_f = xp[:, 0:H4]                 # (S*BP, 4H)  128-lane-aligned slices (free)
    xp_r = xp[:, H4:2 * H4]

    whh_f = whh_f_ref[...]             # (H, 4H)
    whh_r = whh_r_ref[...]

    def cell(xp_t, h, c, whh):
        # one (BP,H)@(H,4H) matmul for all four gates; one full-vreg sigmoid, slice after
        gates = xp_t + jnp.dot(h, whh, preferred_element_type=jnp.float32)    # (BP, 4H)
        sg = jax.nn.sigmoid(gates)           # i|f|.|o in a single EUP pass (g col unused)
        tg = jnp.tanh(gates[:, 2 * H:3 * H])
        i = sg[:, 0 * H:1 * H]
        f = sg[:, 1 * H:2 * H]
        o = sg[:, 3 * H:4 * H]
        c_new = f * c + i * tg
        h_new = o * jnp.tanh(c_new)
        return h_new, c_new

    zeros = jnp.zeros((BP, H), jnp.float32)
    hf, cf, hb, cb = zeros, zeros, zeros, zeros
    out_f = [None] * S
    out_b = [None] * S
    # Fully unrolled (S small & static).  Forward step t and backward step S-1-t are
    # independent dependency chains interleaved for ILP.
    for t in range(S):
        tb = S - 1 - t
        hf, cf = cell(xp_f[t * BP:(t + 1) * BP, :], hf, cf, whh_f)
        hb, cb = cell(xp_r[tb * BP:(tb + 1) * BP, :], hb, cb, whh_r)
        out_f[t] = hf
        out_b[tb] = hb

    # ---- attention + output head (register values only; no VMEM scratch) ----
    # torch quirk: final_hidden_state (2,B,H).view(B,2H) is a row-major view: flat chunk
    # k = d*B + b lands at hid[k//2, (k%2)*H:(k%2+1)*H].  Keep hid split into the halves
    # that multiply the fwd / bwd feature halves so the epilogue needs no lane concats.
    chunks = ([hf[b:b + 1, :] for b in range(B)]
              + [hb[b:b + 1, :] for b in range(B)])                           # 2B x (1,H)
    pad = [jnp.zeros((BP - B, H), jnp.float32)] if BP > B else []
    hid_f = jnp.concatenate([chunks[2 * r] for r in range(B)] + pad, axis=0)      # (BP,H)
    hid_b = jnp.concatenate([chunks[2 * r + 1] for r in range(B)] + pad, axis=0)  # (BP,H)

    lo_f = jnp.stack(out_f, axis=0)                                           # (S, BP, H)
    lo_b = jnp.stack(out_b, axis=0)                                           # (S, BP, H)
    scores = (jnp.sum(lo_f * hid_f[None, :, :], axis=-1, keepdims=True)
              + jnp.sum(lo_b * hid_b[None, :, :], axis=-1, keepdims=True))    # (S, BP, 1)
    m = jnp.max(scores, axis=0, keepdims=True)
    e = jnp.exp(scores - m)
    soft = e / jnp.sum(e, axis=0, keepdims=True)                              # softmax over seq
    ctx_f = jnp.sum(lo_f * soft, axis=0)                                      # (BP, H)
    ctx_b = jnp.sum(lo_b * soft, axis=0)                                      # (BP, H)

    logits = (jnp.dot(ctx_f, w_out_ref[0:H, :], preferred_element_type=jnp.float32)
              + jnp.dot(ctx_b, w_out_ref[H:2 * H, :], preferred_element_type=jnp.float32)
              + b_out_ref[...])                                               # (BP, C)
    logits_ref[...] = logits[0:B, :]


def bilstm_attention_forward(X, params):
    B, S = X.shape
    C = params["w_out"].shape[-1]
    BP = max(8, -(-B // 8) * 8)        # pad batch to the 8-sublane granule

    # tiny int32 index prep; the f32 gather/permute itself happens inside the kernel
    idx = jnp.transpose(X).astype(jnp.int32)                                  # (S, B)
    idx = jnp.pad(idx, ((0, 0), (0, BP - B)), constant_values=-1)             # (S, BP)
    idx = idx.reshape(S * BP, 1)

    vmem = pl.BlockSpec(memory_space=pltpu.MemorySpace.VMEM)
    kernel = functools.partial(bilstm_attn_kernel, S=S, B=B, BP=BP)
    return pl.pallas_call(
        kernel,
        out_shape=jax.ShapeDtypeStruct((B, C), jnp.float32),
        in_specs=[vmem] * 8,
        out_specs=vmem,
    )(idx, params["emb_table"], params["wih_cat"], params["b_cat"],
      params["whh_f"], params["whh_r"], params["w_out"], params["b_out"])


def init_params(key, vocab_size, E, H, C):
    # LSTM weights stored gate-fused (columns [i|f|g|o], PyTorch order) and with the two
    # directions concatenated along lanes for w_ih / bias: wih_cat (E,8H), b_cat (1,8H),
    # so 8H = 256 fills the 256-wide v6e/v7x MXU in a single input-projection pass.
    ks = jax.random.split(key, 11)
    k = 1.0 / math.sqrt(H)
    ko = 1.0 / math.sqrt(2 * H)
    u = lambda kk, shape, s: jax.random.uniform(kk, shape, jnp.float32, -s, s)
    wih_f = u(ks[1], (E, 4 * H), k)
    wih_r = u(ks[5], (E, 4 * H), k)
    b_f = u(ks[3], (1, 4 * H), k) + u(ks[4], (1, 4 * H), k)      # b_ih + b_hh
    b_r = u(ks[7], (1, 4 * H), k) + u(ks[8], (1, 4 * H), k)
    return dict(
        emb_table=jax.random.normal(ks[0], (vocab_size, E), jnp.float32),
        wih_cat=jnp.concatenate([wih_f, wih_r], axis=1),         # (E, 8H)
        b_cat=jnp.concatenate([b_f, b_r], axis=1),               # (1, 8H)
        whh_f=u(ks[2], (H, 4 * H), k),
        whh_r=u(ks[6], (H, 4 * H), k),
        w_out=u(ks[9], (2 * H, C), ko),
        b_out=u(ks[10], (1, C), ko),
    )


def reference_forward(X, params):
    # pure-JAX reference mirroring the PyTorch forward exactly
    emb = jnp.take(params["emb_table"], X, axis=0)
    emb = jnp.transpose(emb, (1, 0, 2)).astype(jnp.float32)                   # (S, B, E)
    B = X.shape[0]
    H = params["whh_f"].shape[0]
    wih_f = params["wih_cat"][:, :4 * H]
    wih_r = params["wih_cat"][:, 4 * H:]
    b_f = params["b_cat"][:, :4 * H]
    b_r = params["b_cat"][:, 4 * H:]

    def run_dir(seq, wih, whh, b):
        def step(carry, x):
            h, c = carry
            gates = x @ wih + h @ whh + b
            i = jax.nn.sigmoid(gates[:, 0 * H:1 * H])
            f = jax.nn.sigmoid(gates[:, 1 * H:2 * H])
            g = jnp.tanh(gates[:, 2 * H:3 * H])
            o = jax.nn.sigmoid(gates[:, 3 * H:4 * H])
            c = f * c + i * g
            h = o * jnp.tanh(c)
            return (h, c), h
        init = (jnp.zeros((B, H), jnp.float32), jnp.zeros((B, H), jnp.float32))
        (hT, _), outs = jax.lax.scan(step, init, seq)
        return outs, hT

    out_f, hf = run_dir(emb, wih_f, params["whh_f"], b_f)
    out_b_rev, hb = run_dir(emb[::-1], wih_r, params["whh_r"], b_r)
    out_b = out_b_rev[::-1]
    lstm_out = jnp.concatenate([out_f, out_b], axis=-1)                       # (S, B, 2H)
    fh = jnp.stack([hf, hb], axis=0)                                          # (2, B, H)
    hid = fh.reshape(B, 2 * H)                                                # torch view quirk
    scores = jnp.einsum("sbj,bj->bs", lstm_out, hid)                          # (B, S)
    soft = jax.nn.softmax(scores, axis=1)
    context = jnp.einsum("sbj,bs->bj", lstm_out, soft)                        # (B, 2H)
    return context @ params["w_out"] + params["b_out"]


if __name__ == "__main__":
    vocab_size, E, H, C = 50, 32, 32, 8
    B, S = 2, 8

    key = jax.random.PRNGKey(0)
    kp, kx = jax.random.split(key)
    params = init_params(kp, vocab_size, E, H, C)
    X = jax.random.randint(kx, (B, S), 0, vocab_size, dtype=jnp.int32)

    logits = bilstm_attention_forward(X, params)
    logits = jax.block_until_ready(logits)

    ref = reference_forward(X, params)
    assert logits.shape == (B, C)
    np.testing.assert_allclose(np.asarray(logits), np.asarray(ref), rtol=2e-4, atol=1e-4)

    print("KERNEL_OK")
</pallas_src>

<mosaic_0001>
module attributes {stable_mosaic.version = 11 : i64} {
  func.func @bilstm_attn_kernel(%arg0: memref<64x1xi32, #tpu.memory_space<vmem>>, %arg1: memref<50x32xf32, #tpu.memory_space<vmem>>, %arg2: memref<32x256xf32, #tpu.memory_space<vmem>>, %arg3: memref<1x256xf32, #tpu.memory_space<vmem>>, %arg4: memref<32x128xf32, #tpu.memory_space<vmem>>, %arg5: memref<32x128xf32, #tpu.memory_space<vmem>>, %arg6: memref<64x8xf32, #tpu.memory_space<vmem>>, %arg7: memref<1x8xf32, #tpu.memory_space<vmem>>, %arg8: memref<2x8xf32, #tpu.memory_space<vmem>>) attributes {dimension_semantics = [], scalar_prefetch = 0 : i64, scratch_operands = 0 : i64, tpu.core_type = #tpu.core_type<tc>} {
    %c0 = arith.constant 0 : index
    %c0_0 = arith.constant 0 : index
    %0 = vector.load %arg0[%c0, %c0_0] : memref<64x1xi32, #tpu.memory_space<vmem>>, vector<64x1xi32>
    %1 = tpu.iota {dimensions = array<i32: 1>} : vector<64x50xi32>
    %2 = vector.broadcast %0 : vector<64x1xi32> to vector<64x50xi32>
    %3 = arith.cmpi eq, %2, %1 : vector<64x50xi32>
    %4 = arith.extui %3 : vector<64x50xi1> to vector<64x50xi32>
    %5 = arith.sitofp %4 : vector<64x50xi32> to vector<64x50xf32>
    %c0_1 = arith.constant 0 : index
    %c0_2 = arith.constant 0 : index
    %6 = vector.load %arg1[%c0_1, %c0_2] : memref<50x32xf32, #tpu.memory_space<vmem>>, vector<50x32xf32>
    %cst = arith.constant dense<0.000000e+00> : vector<64x32xf32>
    %7 = tpu.matmul %5, %6, %cst {dimension_numbers = #tpu.dot_dimension_numbers<[1], [0], [0], [1], [0, 0, 1, 1], [], []>} : vector<64x50xf32>, vector<50x32xf32>, vector<64x32xf32> -> vector<64x32xf32>
    %c0_3 = arith.constant 0 : index
    %c0_4 = arith.constant 0 : index
    %8 = vector.load %arg2[%c0_3, %c0_4] : memref<32x256xf32, #tpu.memory_space<vmem>>, vector<32x256xf32>
    %cst_5 = arith.constant dense<0.000000e+00> : vector<64x256xf32>
    %9 = tpu.matmul %7, %8, %cst_5 {dimension_numbers = #tpu.dot_dimension_numbers<[1], [0], [0], [1], [0, 0, 1, 1], [], []>} : vector<64x32xf32>, vector<32x256xf32>, vector<64x256xf32> -> vector<64x256xf32>
    %c0_6 = arith.constant 0 : index
    %c0_7 = arith.constant 0 : index
    %10 = vector.load %arg3[%c0_6, %c0_7] : memref<1x256xf32, #tpu.memory_space<vmem>>, vector<1x256xf32>
    %11 = vector.broadcast %10 : vector<1x256xf32> to vector<64x256xf32>
    %12 = arith.addf %9, %11 : vector<64x256xf32>
    %13 = vector.extract_strided_slice %12 {offsets = [0, 0], sizes = [64, 128], strides = [1, 1]} : vector<64x256xf32> to vector<64x128xf32>
    %14 = vector.extract_strided_slice %12 {offsets = [0, 128], sizes = [64, 128], strides = [1, 1]} : vector<64x256xf32> to vector<64x128xf32>
    %c0_8 = arith.constant 0 : index
    %c0_9 = arith.constant 0 : index
    %15 = vector.load %arg4[%c0_8, %c0_9] : memref<32x128xf32, #tpu.memory_space<vmem>>, vector<32x128xf32>
    %c0_10 = arith.constant 0 : index
    %c0_11 = arith.constant 0 : index
    %16 = vector.load %arg5[%c0_10, %c0_11] : memref<32x128xf32, #tpu.memory_space<vmem>>, vector<32x128xf32>
    %cst_12 = arith.constant 0.000000e+00 : f32
    %17 = vector.broadcast %cst_12 : f32 to vector<8x32xf32>
    %18 = vector.extract_strided_slice %13 {offsets = [0, 0], sizes = [8, 128], strides = [1, 1]} : vector<64x128xf32> to vector<8x128xf32>
    %cst_13 = arith.constant dense<0.000000e+00> : vector<8x128xf32>
    %19 = tpu.matmul %17, %15, %cst_13 {dimension_numbers = #tpu.dot_dimension_numbers<[1], [0], [0], [1], [0, 0, 1, 1], [], []>} : vector<8x32xf32>, vector<32x128xf32>, vector<8x128xf32> -> vector<8x128xf32>
    %20 = arith.addf %18, %19 : vector<8x128xf32>
    %21 = arith.negf %20 : vector<8x128xf32>
    %22 = math.exp %21 : vector<8x128xf32>
    %cst_14 = arith.constant 1.000000e+00 : f32
    %23 = vector.broadcast %cst_14 : f32 to vector<8x128xf32>
    %24 = arith.addf %23, %22 : vector<8x128xf32>
    %25 = arith.divf %23, %24 : vector<8x128xf32>
    %26 = vector.extract_strided_slice %20 {offsets = [0, 64], sizes = [8, 32], strides = [1, 1]} : vector<8x128xf32> to vector<8x32xf32>
    %27 = math.tanh %26 : vector<8x32xf32>
    %28 = vector.extract_strided_slice %25 {offsets = [0, 0], sizes = [8, 32], strides = [1, 1]} : vector<8x128xf32> to vector<8x32xf32>
    %29 = vector.extract_strided_slice %25 {offsets = [0, 32], sizes = [8, 32], strides = [1, 1]} : vector<8x128xf32> to vector<8x32xf32>
    %30 = vector.extract_strided_slice %25 {offsets = [0, 96], sizes = [8, 32], strides = [1, 1]} : vector<8x128xf32> to vector<8x32xf32>
    %31 = arith.mulf %29, %17 : vector<8x32xf32>
    %32 = arith.mulf %28, %27 : vector<8x32xf32>
    %33 = arith.addf %31, %32 : vector<8x32xf32>
    %34 = math.tanh %33 : vector<8x32xf32>
    %35 = arith.mulf %30, %34 : vector<8x32xf32>
    %36 = vector.extract_strided_slice %14 {offsets = [56, 0], sizes = [8, 128], strides = [1, 1]} : vector<64x128xf32> to vector<8x128xf32>
    %cst_15 = arith.constant dense<0.000000e+00> : vector<8x128xf32>
    %37 = tpu.matmul %17, %16, %cst_15 {dimension_numbers = #tpu.dot_dimension_numbers<[1], [0], [0], [1], [0, 0, 1, 1], [], []>} : vector<8x32xf32>, vector<32x128xf32>, vector<8x128xf32> -> vector<8x128xf32>
    %38 = arith.addf %36, %37 : vector<8x128xf32>
    %39 = arith.negf %38 : vector<8x128xf32>
    %40 = math.exp %39 : vector<8x128xf32>
    %cst_16 = arith.constant 1.000000e+00 : f32
    %41 = vector.broadcast %cst_16 : f32 to vector<8x128xf32>
    %42 = arith.addf %41, %40 : vector<8x128xf32>
    %43 = arith.divf %41, %42 : vector<8x128xf32>
    %44 = vector.extract_strided_slice %38 {offsets = [0, 64], sizes = [8, 32], strides = [1, 1]} : vector<8x128xf32> to vector<8x32xf32>
    %45 = math.tanh %44 : vector<8x32xf32>
    %46 = vector.extract_strided_slice %43 {offsets = [0, 0], sizes = [8, 32], strides = [1, 1]} : vector<8x128xf32> to vector<8x32xf32>
    %47 = vector.extract_strided_slice %43 {offsets = [0, 32], sizes = [8, 32], strides = [1, 1]} : vector<8x128xf32> to vector<8x32xf32>
    %48 = vector.extract_strided_slice %43 {offsets = [0, 96], sizes = [8, 32], strides = [1, 1]} : vector<8x128xf32> to vector<8x32xf32>
    %49 = arith.mulf %47, %17 : vector<8x32xf32>
    %50 = arith.mulf %46, %45 : vector<8x32xf32>
    %51 = arith.addf %49, %50 : vector<8x32xf32>
    %52 = math.tanh %51 : vector<8x32xf32>
    %53 = arith.mulf %48, %52 : vector<8x32xf32>
    %54 = vector.extract_strided_slice %13 {offsets = [8, 0], sizes = [8, 128], strides = [1, 1]} : vector<64x128xf32> to vector<8x128xf32>
    %cst_17 = arith.constant dense<0.000000e+00> : vector<8x128xf32>
    %55 = tpu.matmul %35, %15, %cst_17 {dimension_numbers = #tpu.dot_dimension_numbers<[1], [0], [0], [1], [0, 0, 1, 1], [], []>} : vector<8x32xf32>, vector<32x128xf32>, vector<8x128xf32> -> vector<8x128xf32>
    %56 = arith.addf %54, %55 : vector<8x128xf32>
    %57 = arith.negf %56 : vector<8x128xf32>
    %58 = math.exp %57 : vector<8x128xf32>
    %cst_18 = arith.constant 1.000000e+00 : f32
    %59 = vector.broadcast %cst_18 : f32 to vector<8x128xf32>
    %60 = arith.addf %59, %58 : vector<8x128xf32>
    %61 = arith.divf %59, %60 : vector<8x128xf32>
    %62 = vector.extract_strided_slice %56 {offsets = [0, 64], sizes = [8, 32], strides = [1, 1]} : vector<8x128xf32> to vector<8x32xf32>
    %63 = math.tanh %62 : vector<8x32xf32>
    %64 = vector.extract_strided_slice %61 {offsets = [0, 0], sizes = [8, 32], strides = [1, 1]} : vector<8x128xf32> to vector<8x32xf32>
    %65 = vector.extract_strided_slice %61 {offsets = [0, 32], sizes = [8, 32], strides = [1, 1]} : vector<8x128xf32> to vector<8x32xf32>
    %66 = vector.extract_strided_slice %61 {offsets = [0, 96], sizes = [8, 32], strides = [1, 1]} : vector<8x128xf32> to vector<8x32xf32>
    %67 = arith.mulf %65, %33 : vector<8x32xf32>
    %68 = arith.mulf %64, %63 : vector<8x32xf32>
    %69 = arith.addf %67, %68 : vector<8x32xf32>
    %70 = math.tanh %69 : vector<8x32xf32>
    %71 = arith.mulf %66, %70 : vector<8x32xf32>
    %72 = vector.extract_strided_slice %14 {offsets = [48, 0], sizes = [8, 128], strides = [1, 1]} : vector<64x128xf32> to vector<8x128xf32>
    %cst_19 = arith.constant dense<0.000000e+00> : vector<8x128xf32>
    %73 = tpu.matmul %53, %16, %cst_19 {dimension_numbers = #tpu.dot_dimension_numbers<[1], [0], [0], [1], [0, 0, 1, 1], [], []>} : vector<8x32xf32>, vector<32x128xf32>, vector<8x128xf32> -> vector<8x128xf32>
    %74 = arith.addf %72, %73 : vector<8x128xf32>
    %75 = arith.negf %74 : vector<8x128xf32>
    %76 = math.exp %75 : vector<8x128xf32>
    %cst_20 = arith.constant 1.000000e+00 : f32
    %77 = vector.broadcast %cst_20 : f32 to vector<8x128xf32>
    %78 = arith.addf %77, %76 : vector<8x128xf32>
    %79 = arith.divf %77, %78 : vector<8x128xf32>
    %80 = vector.extract_strided_slice %74 {offsets = [0, 64], sizes = [8, 32], strides = [1, 1]} : vector<8x128xf32> to vector<8x32xf32>
    %81 = math.tanh %80 : vector<8x32xf32>
    %82 = vector.extract_strided_slice %79 {offsets = [0, 0], sizes = [8, 32], strides = [1, 1]} : vector<8x128xf32> to vector<8x32xf32>
    %83 = vector.extract_strided_slice %79 {offsets = [0, 32], sizes = [8, 32], strides = [1, 1]} : vector<8x128xf32> to vector<8x32xf32>
    %84 = vector.extract_strided_slice %79 {offsets = [0, 96], sizes = [8, 32], strides = [1, 1]} : vector<8x128xf32> to vector<8x32xf32>
    %85 = arith.mulf %83, %51 : vector<8x32xf32>
    %86 = arith.mulf %82, %81 : vector<8x32xf32>
    %87 = arith.addf %85, %86 : vector<8x32xf32>
    %88 = math.tanh %87 : vector<8x32xf32>
    %89 = arith.mulf %84, %88 : vector<8x32xf32>
    %90 = vector.extract_strided_slice %13 {offsets = [16, 0], sizes = [8, 128], strides = [1, 1]} : vector<64x128xf32> to vector<8x128xf32>
    %cst_21 = arith.constant dense<0.000000e+00> : vector<8x128xf32>
    %91 = tpu.matmul %71, %15, %cst_21 {dimension_numbers = #tpu.dot_dimension_numbers<[1], [0], [0], [1], [0, 0, 1, 1], [], []>} : vector<8x32xf32>, vector<32x128xf32>, vector<8x128xf32> -> vector<8x128xf32>
    %92 = arith.addf %90, %91 : vector<8x128xf32>
    %93 = arith.negf %92 : vector<8x128xf32>
    %94 = math.exp %93 : vector<8x128xf32>
    %cst_22 = arith.constant 1.000000e+00 : f32
    %95 = vector.broadcast %cst_22 : f32 to vector<8x128xf32>
    %96 = arith.addf %95, %94 : vector<8x128xf32>
    %97 = arith.divf %95, %96 : vector<8x128xf32>
    %98 = vector.extract_strided_slice %92 {offsets = [0, 64], sizes = [8, 32], strides = [1, 1]} : vector<8x128xf32> to vector<8x32xf32>
    %99 = math.tanh %98 : vector<8x32xf32>
    %100 = vector.extract_strided_slice %97 {offsets = [0, 0], sizes = [8, 32], strides = [1, 1]} : vector<8x128xf32> to vector<8x32xf32>
    %101 = vector.extract_strided_slice %97 {offsets = [0, 32], sizes = [8, 32], strides = [1, 1]} : vector<8x128xf32> to vector<8x32xf32>
    %102 = vector.extract_strided_slice %97 {offsets = [0, 96], sizes = [8, 32], strides = [1, 1]} : vector<8x128xf32> to vector<8x32xf32>
    %103 = arith.mulf %101, %69 : vector<8x32xf32>
    %104 = arith.mulf %100, %99 : vector<8x32xf32>
    %105 = arith.addf %103, %104 : vector<8x32xf32>
    %106 = math.tanh %105 : vector<8x32xf32>
    %107 = arith.mulf %102, %106 : vector<8x32xf32>
    %108 = vector.extract_strided_slice %14 {offsets = [40, 0], sizes = [8, 128], strides = [1, 1]} : vector<64x128xf32> to vector<8x128xf32>
    %cst_23 = arith.constant dense<0.000000e+00> : vector<8x128xf32>
    %109 = tpu.matmul %89, %16, %cst_23 {dimension_numbers = #tpu.dot_dimension_numbers<[1], [0], [0], [1], [0, 0, 1, 1], [], []>} : vector<8x32xf32>, vector<32x128xf32>, vector<8x128xf32> -> vector<8x128xf32>
    %110 = arith.addf %108, %109 : vector<8x128xf32>
    %111 = arith.negf %110 : vector<8x128xf32>
    %112 = math.exp %111 : vector<8x128xf32>
    %cst_24 = arith.constant 1.000000e+00 : f32
    %113 = vector.broadcast %cst_24 : f32 to vector<8x128xf32>
    %114 = arith.addf %113, %112 : vector<8x128xf32>
    %115 = arith.divf %113, %114 : vector<8x128xf32>
    %116 = vector.extract_strided_slice %110 {offsets = [0, 64], sizes = [8, 32], strides = [1, 1]} : vector<8x128xf32> to vector<8x32xf32>
    %117 = math.tanh %116 : vector<8x32xf32>
    %118 = vector.extract_strided_slice %115 {offsets = [0, 0], sizes = [8, 32], strides = [1, 1]} : vector<8x128xf32> to vector<8x32xf32>
    %119 = vector.extract_strided_slice %115 {offsets = [0, 32], sizes = [8, 32], strides = [1, 1]} : vector<8x128xf32> to vector<8x32xf32>
    %120 = vector.extract_strided_slice %115 {offsets = [0, 96], sizes = [8, 32], strides = [1, 1]} : vector<8x128xf32> to vector<8x32xf32>
    %121 = arith.mulf %119, %87 : vector<8x32xf32>
    %122 = arith.mulf %118, %117 : vector<8x32xf32>
    %123 = arith.addf %121, %122 : vector<8x32xf32>
    %124 = math.tanh %123 : vector<8x32xf32>
    %125 = arith.mulf %120, %124 : vector<8x32xf32>
    %126 = vector.extract_strided_slice %13 {offsets = [24, 0], sizes = [8, 128], strides = [1, 1]} : vector<64x128xf32> to vector<8x128xf32>
    %cst_25 = arith.constant dense<0.000000e+00> : vector<8x128xf32>
    %127 = tpu.matmul %107, %15, %cst_25 {dimension_numbers = #tpu.dot_dimension_numbers<[1], [0], [0], [1], [0, 0, 1, 1], [], []>} : vector<8x32xf32>, vector<32x128xf32>, vector<8x128xf32> -> vector<8x128xf32>
    %128 = arith.addf %126, %127 : vector<8x128xf32>
    %129 = arith.negf %128 : vector<8x128xf32>
    %130 = math.exp %129 : vector<8x128xf32>
    %cst_26 = arith.constant 1.000000e+00 : f32
    %131 = vector.broadcast %cst_26 : f32 to vector<8x128xf32>
    %132 = arith.addf %131, %130 : vector<8x128xf32>
    %133 = arith.divf %131, %132 : vector<8x128xf32>
    %134 = vector.extract_strided_slice %128 {offsets = [0, 64], sizes = [8, 32], strides = [1, 1]} : vector<8x128xf32> to vector<8x32xf32>
    %135 = math.tanh %134 : vector<8x32xf32>
    %136 = vector.extract_strided_slice %133 {offsets = [0, 0], sizes = [8, 32], strides = [1, 1]} : vector<8x128xf32> to vector<8x32xf32>
    %137 = vector.extract_strided_slice %133 {offsets = [0, 32], sizes = [8, 32], strides = [1, 1]} : vector<8x128xf32> to vector<8x32xf32>
    %138 = vector.extract_strided_slice %133 {offsets = [0, 96], sizes = [8, 32], strides = [1, 1]} : vector<8x128xf32> to vector<8x32xf32>
    %139 = arith.mulf %137, %105 : vector<8x32xf32>
    %140 = arith.mulf %136, %135 : vector<8x32xf32>
    %141 = arith.addf %139, %140 : vector<8x32xf32>
    %142 = math.tanh %141 : vector<8x32xf32>
    %143 = arith.mulf %138, %142 : vector<8x32xf32>
    %144 = vector.extract_strided_slice %14 {offsets = [32, 0], sizes = [8, 128], strides = [1, 1]} : vector<64x128xf32> to vector<8x128xf32>
    %cst_27 = arith.constant dense<0.000000e+00> : vector<8x128xf32>
    %145 = tpu.matmul %125, %16, %cst_27 {dimension_numbers = #tpu.dot_dimension_numbers<[1], [0], [0], [1], [0, 0, 1, 1], [], []>} : vector<8x32xf32>, vector<32x128xf32>, vector<8x128xf32> -> vector<8x128xf32>
    %146 = arith.addf %144, %145 : vector<8x128xf32>
    %147 = arith.negf %146 : vector<8x128xf32>
    %148 = math.exp %147 : vector<8x128xf32>
    %cst_28 = arith.constant 1.000000e+00 : f32
    %149 = vector.broadcast %cst_28 : f32 to vector<8x128xf32>
    %150 = arith.addf %149, %148 : vector<8x128xf32>
    %151 = arith.divf %149, %150 : vector<8x128xf32>
    %152 = vector.extract_strided_slice %146 {offsets = [0, 64], sizes = [8, 32], strides = [1, 1]} : vector<8x128xf32> to vector<8x32xf32>
    %153 = math.tanh %152 : vector<8x32xf32>
    %154 = vector.extract_strided_slice %151 {offsets = [0, 0], sizes = [8, 32], strides = [1, 1]} : vector<8x128xf32> to vector<8x32xf32>
    %155 = vector.extract_strided_slice %151 {offsets = [0, 32], sizes = [8, 32], strides = [1, 1]} : vector<8x128xf32> to vector<8x32xf32>
    %156 = vector.extract_strided_slice %151 {offsets = [0, 96], sizes = [8, 32], strides = [1, 1]} : vector<8x128xf32> to vector<8x32xf32>
    %157 = arith.mulf %155, %123 : vector<8x32xf32>
    %158 = arith.mulf %154, %153 : vector<8x32xf32>
    %159 = arith.addf %157, %158 : vector<8x32xf32>
    %160 = math.tanh %159 : vector<8x32xf32>
    %161 = arith.mulf %156, %160 : vector<8x32xf32>
    %162 = vector.extract_strided_slice %13 {offsets = [32, 0], sizes = [8, 128], strides = [1, 1]} : vector<64x128xf32> to vector<8x128xf32>
    %cst_29 = arith.constant dense<0.000000e+00> : vector<8x128xf32>
    %163 = tpu.matmul %143, %15, %cst_29 {dimension_numbers = #tpu.dot_dimension_numbers<[1], [0], [0], [1], [0, 0, 1, 1], [], []>} : vector<8x32xf32>, vector<32x128xf32>, vector<8x128xf32> -> vector<8x128xf32>
    %164 = arith.addf %162, %163 : vector<8x128xf32>
    %165 = arith.negf %164 : vector<8x128xf32>
    %166 = math.exp %165 : vector<8x128xf32>
    %cst_30 = arith.constant 1.000000e+00 : f32
    %167 = vector.broadcast %cst_30 : f32 to vector<8x128xf32>
    %168 = arith.addf %167, %166 : vector<8x128xf32>
    %169 = arith.divf %167, %168 : vector<8x128xf32>
    %170 = vector.extract_strided_slice %164 {offsets = [0, 64], sizes = [8, 32], strides = [1, 1]} : vector<8x128xf32> to vector<8x32xf32>
    %171 = math.tanh %170 : vector<8x32xf32>
    %172 = vector.extract_strided_slice %169 {offsets = [0, 0], sizes = [8, 32], strides = [1, 1]} : vector<8x128xf32> to vector<8x32xf32>
    %173 = vector.extract_strided_slice %169 {offsets = [0, 32], sizes = [8, 32], strides = [1, 1]} : vector<8x128xf32> to vector<8x32xf32>
    %174 = vector.extract_strided_slice %169 {offsets = [0, 96], sizes = [8, 32], strides = [1, 1]} : vector<8x128xf32> to vector<8x32xf32>
    %175 = arith.mulf %173, %141 : vector<8x32xf32>
    %176 = arith.mulf %172, %171 : vector<8x32xf32>
    %177 = arith.addf %175, %176 : vector<8x32xf32>
    %178 = math.tanh %177 : vector<8x32xf32>
    %179 = arith.mulf %174, %178 : vector<8x32xf32>
    %180 = vector.extract_strided_slice %14 {offsets = [24, 0], sizes = [8, 128], strides = [1, 1]} : vector<64x128xf32> to vector<8x128xf32>
    %cst_31 = arith.constant dense<0.000000e+00> : vector<8x128xf32>
    %181 = tpu.matmul %161, %16, %cst_31 {dimension_numbers = #tpu.dot_dimension_numbers<[1], [0], [0], [1], [0, 0, 1, 1], [], []>} : vector<8x32xf32>, vector<32x128xf32>, vector<8x128xf32> -> vector<8x128xf32>
    %182 = arith.addf %180, %181 : vector<8x128xf32>
    %183 = arith.negf %182 : vector<8x128xf32>
    %184 = math.exp %183 : vector<8x128xf32>
    %cst_32 = arith.constant 1.000000e+00 : f32
    %185 = vector.broadcast %cst_32 : f32 to vector<8x128xf32>
    %186 = arith.addf %185, %184 : vector<8x128xf32>
    %187 = arith.divf %185, %186 : vector<8x128xf32>
    %188 = vector.extract_strided_slice %182 {offsets = [0, 64], sizes = [8, 32], strides = [1, 1]} : vector<8x128xf32> to vector<8x32xf32>
    %189 = math.tanh %188 : vector<8x32xf32>
    %190 = vector.extract_strided_slice %187 {offsets = [0, 0], sizes = [8, 32], strides = [1, 1]} : vector<8x128xf32> to vector<8x32xf32>
    %191 = vector.extract_strided_slice %187 {offsets = [0, 32], sizes = [8, 32], strides = [1, 1]} : vector<8x128xf32> to vector<8x32xf32>
    %192 = vector.extract_strided_slice %187 {offsets = [0, 96], sizes = [8, 32], strides = [1, 1]} : vector<8x128xf32> to vector<8x32xf32>
    %193 = arith.mulf %191, %159 : vector<8x32xf32>
    %194 = arith.mulf %190, %189 : vector<8x32xf32>
    %195 = arith.addf %193, %194 : vector<8x32xf32>
    %196 = math.tanh %195 : vector<8x32xf32>
    %197 = arith.mulf %192, %196 : vector<8x32xf32>
    %198 = vector.extract_strided_slice %13 {offsets = [40, 0], sizes = [8, 128], strides = [1, 1]} : vector<64x128xf32> to vector<8x128xf32>
    %cst_33 = arith.constant dense<0.000000e+00> : vector<8x128xf32>
    %199 = tpu.matmul %179, %15, %cst_33 {dimension_numbers = #tpu.dot_dimension_numbers<[1], [0], [0], [1], [0, 0, 1, 1], [], []>} : vector<8x32xf32>, vector<32x128xf32>, vector<8x128xf32> -> vector<8x128xf32>
    %200 = arith.addf %198, %199 : vector<8x128xf32>
    %201 = arith.negf %200 : vector<8x128xf32>
    %202 = math.exp %201 : vector<8x128xf32>
    %cst_34 = arith.constant 1.000000e+00 : f32
    %203 = vector.broadcast %cst_34 : f32 to vector<8x128xf32>
    %204 = arith.addf %203, %202 : vector<8x128xf32>
    %205 = arith.divf %203, %204 : vector<8x128xf32>
    %206 = vector.extract_strided_slice %200 {offsets = [0, 64], sizes = [8, 32], strides = [1, 1]} : vector<8x128xf32> to vector<8x32xf32>
    %207 = math.tanh %206 : vector<8x32xf32>
    %208 = vector.extract_strided_slice %205 {offsets = [0, 0], sizes = [8, 32], strides = [1, 1]} : vector<8x128xf32> to vector<8x32xf32>
    %209 = vector.extract_strided_slice %205 {offsets = [0, 32], sizes = [8, 32], strides = [1, 1]} : vector<8x128xf32> to vector<8x32xf32>
    %210 = vector.extract_strided_slice %205 {offsets = [0, 96], sizes = [8, 32], strides = [1, 1]} : vector<8x128xf32> to vector<8x32xf32>
    %211 = arith.mulf %209, %177 : vector<8x32xf32>
    %212 = arith.mulf %208, %207 : vector<8x32xf32>
    %213 = arith.addf %211, %212 : vector<8x32xf32>
    %214 = math.tanh %213 : vector<8x32xf32>
    %215 = arith.mulf %210, %214 : vector<8x32xf32>
    %216 = vector.extract_strided_slice %14 {offsets = [16, 0], sizes = [8, 128], strides = [1, 1]} : vector<64x128xf32> to vector<8x128xf32>
    %cst_35 = arith.constant dense<0.000000e+00> : vector<8x128xf32>
    %217 = tpu.matmul %197, %16, %cst_35 {dimension_numbers = #tpu.dot_dimension_numbers<[1], [0], [0], [1], [0, 0, 1, 1], [], []>} : vector<8x32xf32>, vector<32x128xf32>, vector<8x128xf32> -> vector<8x128xf32>
    %218 = arith.addf %216, %217 : vector<8x128xf32>
    %219 = arith.negf %218 : vector<8x128xf32>
    %220 = math.exp %219 : vector<8x128xf32>
    %cst_36 = arith.constant 1.000000e+00 : f32
    %221 = vector.broadcast %cst_36 : f32 to vector<8x128xf32>
    %222 = arith.addf %221, %220 : vector<8x128xf32>
    %223 = arith.divf %221, %222 : vector<8x128xf32>
    %224 = vector.extract_strided_slice %218 {offsets = [0, 64], sizes = [8, 32], strides = [1, 1]} : vector<8x128xf32> to vector<8x32xf32>
    %225 = math.tanh %224 : vector<8x32xf32>
    %226 = vector.extract_strided_slice %223 {offsets = [0, 0], sizes = [8, 32], strides = [1, 1]} : vector<8x128xf32> to vector<8x32xf32>
    %227 = vector.extract_strided_slice %223 {offsets = [0, 32], sizes = [8, 32], strides = [1, 1]} : vector<8x128xf32> to vector<8x32xf32>
    %228 = vector.extract_strided_slice %223 {offsets = [0, 96], sizes = [8, 32], strides = [1, 1]} : vector<8x128xf32> to vector<8x32xf32>
    %229 = arith.mulf %227, %195 : vector<8x32xf32>
    %230 = arith.mulf %226, %225 : vector<8x32xf32>
    %231 = arith.addf %229, %230 : vector<8x32xf32>
    %232 = math.tanh %231 : vector<8x32xf32>
    %233 = arith.mulf %228, %232 : vector<8x32xf32>
    %234 = vector.extract_strided_slice %13 {offsets = [48, 0], sizes = [8, 128], strides = [1, 1]} : vector<64x128xf32> to vector<8x128xf32>
    %cst_37 = arith.constant dense<0.000000e+00> : vector<8x128xf32>
    %235 = tpu.matmul %215, %15, %cst_37 {dimension_numbers = #tpu.dot_dimension_numbers<[1], [0], [0], [1], [0, 0, 1, 1], [], []>} : vector<8x32xf32>, vector<32x128xf32>, vector<8x128xf32> -> vector<8x128xf32>
    %236 = arith.addf %234, %235 : vector<8x128xf32>
    %237 = arith.negf %236 : vector<8x128xf32>
    %238 = math.exp %237 : vector<8x128xf32>
    %cst_38 = arith.constant 1.000000e+00 : f32
    %239 = vector.broadcast %cst_38 : f32 to vector<8x128xf32>
    %240 = arith.addf %239, %238 : vector<8x128xf32>
    %241 = arith.divf %239, %240 : vector<8x128xf32>
    %242 = vector.extract_strided_slice %236 {offsets = [0, 64], sizes = [8, 32], strides = [1, 1]} : vector<8x128xf32> to vector<8x32xf32>
    %243 = math.tanh %242 : vector<8x32xf32>
    %244 = vector.extract_strided_slice %241 {offsets = [0, 0], sizes = [8, 32], strides = [1, 1]} : vector<8x128xf32> to vector<8x32xf32>
    %245 = vector.extract_strided_slice %241 {offsets = [0, 32], sizes = [8, 32], strides = [1, 1]} : vector<8x128xf32> to vector<8x32xf32>
    %246 = vector.extract_strided_slice %241 {offsets = [0, 96], sizes = [8, 32], strides = [1, 1]} : vector<8x128xf32> to vector<8x32xf32>
    %247 = arith.mulf %245, %213 : vector<8x32xf32>
    %248 = arith.mulf %244, %243 : vector<8x32xf32>
    %249 = arith.addf %247, %248 : vector<8x32xf32>
    %250 = math.tanh %249 : vector<8x32xf32>
    %251 = arith.mulf %246, %250 : vector<8x32xf32>
    %252 = vector.extract_strided_slice %14 {offsets = [8, 0], sizes = [8, 128], strides = [1, 1]} : vector<64x128xf32> to vector<8x128xf32>
    %cst_39 = arith.constant dense<0.000000e+00> : vector<8x128xf32>
    %253 = tpu.matmul %233, %16, %cst_39 {dimension_numbers = #tpu.dot_dimension_numbers<[1], [0], [0], [1], [0, 0, 1, 1], [], []>} : vector<8x32xf32>, vector<32x128xf32>, vector<8x128xf32> -> vector<8x128xf32>
    %254 = arith.addf %252, %253 : vector<8x128xf32>
    %255 = arith.negf %254 : vector<8x128xf32>
    %256 = math.exp %255 : vector<8x128xf32>
    %cst_40 = arith.constant 1.000000e+00 : f32
    %257 = vector.broadcast %cst_40 : f32 to vector<8x128xf32>
    %258 = arith.addf %257, %256 : vector<8x128xf32>
    %259 = arith.divf %257, %258 : vector<8x128xf32>
    %260 = vector.extract_strided_slice %254 {offsets = [0, 64], sizes = [8, 32], strides = [1, 1]} : vector<8x128xf32> to vector<8x32xf32>
    %261 = math.tanh %260 : vector<8x32xf32>
    %262 = vector.extract_strided_slice %259 {offsets = [0, 0], sizes = [8, 32], strides = [1, 1]} : vector<8x128xf32> to vector<8x32xf32>
    %263 = vector.extract_strided_slice %259 {offsets = [0, 32], sizes = [8, 32], strides = [1, 1]} : vector<8x128xf32> to vector<8x32xf32>
    %264 = vector.extract_strided_slice %259 {offsets = [0, 96], sizes = [8, 32], strides = [1, 1]} : vector<8x128xf32> to vector<8x32xf32>
    %265 = arith.mulf %263, %231 : vector<8x32xf32>
    %266 = arith.mulf %262, %261 : vector<8x32xf32>
    %267 = arith.addf %265, %266 : vector<8x32xf32>
    %268 = math.tanh %267 : vector<8x32xf32>
    %269 = arith.mulf %264, %268 : vector<8x32xf32>
    %270 = vector.extract_strided_slice %13 {offsets = [56, 0], sizes = [8, 128], strides = [1, 1]} : vector<64x128xf32> to vector<8x128xf32>
    %cst_41 = arith.constant dense<0.000000e+00> : vector<8x128xf32>
    %271 = tpu.matmul %251, %15, %cst_41 {dimension_numbers = #tpu.dot_dimension_numbers<[1], [0], [0], [1], [0, 0, 1, 1], [], []>} : vector<8x32xf32>, vector<32x128xf32>, vector<8x128xf32> -> vector<8x128xf32>
    %272 = arith.addf %270, %271 : vector<8x128xf32>
    %273 = arith.negf %272 : vector<8x128xf32>
    %274 = math.exp %273 : vector<8x128xf32>
    %cst_42 = arith.constant 1.000000e+00 : f32
    %275 = vector.broadcast %cst_42 : f32 to vector<8x128xf32>
    %276 = arith.addf %275, %274 : vector<8x128xf32>
    %277 = arith.divf %275, %276 : vector<8x128xf32>
    %278 = vector.extract_strided_slice %272 {offsets = [0, 64], sizes = [8, 32], strides = [1, 1]} : vector<8x128xf32> to vector<8x32xf32>
    %279 = math.tanh %278 : vector<8x32xf32>
    %280 = vector.extract_strided_slice %277 {offsets = [0, 0], sizes = [8, 32], strides = [1, 1]} : vector<8x128xf32> to vector<8x32xf32>
    %281 = vector.extract_strided_slice %277 {offsets = [0, 32], sizes = [8, 32], strides = [1, 1]} : vector<8x128xf32> to vector<8x32xf32>
    %282 = vector.extract_strided_slice %277 {offsets = [0, 96], sizes = [8, 32], strides = [1, 1]} : vector<8x128xf32> to vector<8x32xf32>
    %283 = arith.mulf %281, %249 : vector<8x32xf32>
    %284 = arith.mulf %280, %279 : vector<8x32xf32>
    %285 = arith.addf %283, %284 : vector<8x32xf32>
    %286 = math.tanh %285 : vector<8x32xf32>
    %287 = arith.mulf %282, %286 : vector<8x32xf32>
    %288 = vector.extract_strided_slice %14 {offsets = [0, 0], sizes = [8, 128], strides = [1, 1]} : vector<64x128xf32> to vector<8x128xf32>
    %cst_43 = arith.constant dense<0.000000e+00> : vector<8x128xf32>
    %289 = tpu.matmul %269, %16, %cst_43 {dimension_numbers = #tpu.dot_dimension_numbers<[1], [0], [0], [1], [0, 0, 1, 1], [], []>} : vector<8x32xf32>, vector<32x128xf32>, vector<8x128xf32> -> vector<8x128xf32>
    %290 = arith.addf %288, %289 : vector<8x128xf32>
    %291 = arith.negf %290 : vector<8x128xf32>
    %292 = math.exp %291 : vector<8x128xf32>
    %cst_44 = arith.constant 1.000000e+00 : f32
    %293 = vector.broadcast %cst_44 : f32 to vector<8x128xf32>
    %294 = arith.addf %293, %292 : vector<8x128xf32>
    %295 = arith.divf %293, %294 : vector<8x128xf32>
    %296 = vector.extract_strided_slice %290 {offsets = [0, 64], sizes = [8, 32], strides = [1, 1]} : vector<8x128xf32> to vector<8x32xf32>
    %297 = math.tanh %296 : vector<8x32xf32>
    %298 = vector.extract_strided_slice %295 {offsets = [0, 0], sizes = [8, 32], strides = [1, 1]} : vector<8x128xf32> to vector<8x32xf32>
    %299 = vector.extract_strided_slice %295 {offsets = [0, 32], sizes = [8, 32], strides = [1, 1]} : vector<8x128xf32> to vector<8x32xf32>
    %300 = vector.extract_strided_slice %295 {offsets = [0, 96], sizes = [8, 32], strides = [1, 1]} : vector<8x128xf32> to vector<8x32xf32>
    %301 = arith.mulf %299, %267 : vector<8x32xf32>
    %302 = arith.mulf %298, %297 : vector<8x32xf32>
    %303 = arith.addf %301, %302 : vector<8x32xf32>
    %304 = math.tanh %303 : vector<8x32xf32>
    %305 = arith.mulf %300, %304 : vector<8x32xf32>
    %306 = vector.extract_strided_slice %287 {offsets = [0, 0], sizes = [1, 32], strides = [1, 1]} : vector<8x32xf32> to vector<1x32xf32>
    %307 = vector.extract_strided_slice %287 {offsets = [1, 0], sizes = [1, 32], strides = [1, 1]} : vector<8x32xf32> to vector<1x32xf32>
    %308 = vector.extract_strided_slice %305 {offsets = [0, 0], sizes = [1, 32], strides = [1, 1]} : vector<8x32xf32> to vector<1x32xf32>
    %309 = vector.extract_strided_slice %305 {offsets = [1, 0], sizes = [1, 32], strides = [1, 1]} : vector<8x32xf32> to vector<1x32xf32>
    %cst_45 = arith.constant 0.000000e+00 : f32
    %310 = vector.broadcast %cst_45 : f32 to vector<6x32xf32>
    %311 = tpu.concatenate %306, %308, %310 in 0 : vector<1x32xf32>, vector<1x32xf32>, vector<6x32xf32> -> vector<8x32xf32>
    %312 = tpu.concatenate %307, %309, %310 in 0 : vector<1x32xf32>, vector<1x32xf32>, vector<6x32xf32> -> vector<8x32xf32>
    %313 = vector.shape_cast %35 : vector<8x32xf32> to vector<1x8x32xf32>
    %314 = vector.shape_cast %71 : vector<8x32xf32> to vector<1x8x32xf32>
    %315 = vector.shape_cast %107 : vector<8x32xf32> to vector<1x8x32xf32>
    %316 = vector.shape_cast %143 : vector<8x32xf32> to vector<1x8x32xf32>
    %317 = vector.shape_cast %179 : vector<8x32xf32> to vector<1x8x32xf32>
    %318 = vector.shape_cast %215 : vector<8x32xf32> to vector<1x8x32xf32>
    %319 = vector.shape_cast %251 : vector<8x32xf32> to vector<1x8x32xf32>
    %320 = vector.shape_cast %287 : vector<8x32xf32> to vector<1x8x32xf32>
    %321 = tpu.concatenate %313, %314, %315, %316, %317, %318, %319, %320 in 0 : vector<1x8x32xf32>, vector<1x8x32xf32>, vector<1x8x32xf32>, vector<1x8x32xf32>, vector<1x8x32xf32>, vector<1x8x32xf32>, vector<1x8x32xf32>, vector<1x8x32xf32> -> vector<8x8x32xf32>
    %322 = vector.shape_cast %305 : vector<8x32xf32> to vector<1x8x32xf32>
    %323 = vector.shape_cast %269 : vector<8x32xf32> to vector<1x8x32xf32>
    %324 = vector.shape_cast %233 : vector<8x32xf32> to vector<1x8x32xf32>
    %325 = vector.shape_cast %197 : vector<8x32xf32> to vector<1x8x32xf32>
    %326 = vector.shape_cast %161 : vector<8x32xf32> to vector<1x8x32xf32>
    %327 = vector.shape_cast %125 : vector<8x32xf32> to vector<1x8x32xf32>
    %328 = vector.shape_cast %89 : vector<8x32xf32> to vector<1x8x32xf32>
    %329 = vector.shape_cast %53 : vector<8x32xf32> to vector<1x8x32xf32>
    %330 = tpu.concatenate %322, %323, %324, %325, %326, %327, %328, %329 in 0 : vector<1x8x32xf32>, vector<1x8x32xf32>, vector<1x8x32xf32>, vector<1x8x32xf32>, vector<1x8x32xf32>, vector<1x8x32xf32>, vector<1x8x32xf32>, vector<1x8x32xf32> -> vector<8x8x32xf32>
    %331 = vector.shape_cast %311 : vector<8x32xf32> to vector<1x8x32xf32>
    %332 = vector.broadcast %331 : vector<1x8x32xf32> to vector<8x8x32xf32>
    %333 = arith.mulf %321, %332 : vector<8x8x32xf32>
    %cst_46 = arith.constant dense<0.000000e+00> : vector<8x8xf32>
    %334 = vector.multi_reduction <add>, %333, %cst_46 [2] : vector<8x8x32xf32> to vector<8x8xf32>
    %335 = vector.shape_cast %334 : vector<8x8xf32> to vector<8x8x1xf32>
    %336 = vector.shape_cast %312 : vector<8x32xf32> to vector<1x8x32xf32>
    %337 = vector.broadcast %336 : vector<1x8x32xf32> to vector<8x8x32xf32>
    %338 = arith.mulf %330, %337 : vector<8x8x32xf32>
    %cst_47 = arith.constant dense<0.000000e+00> : vector<8x8xf32>
    %339 = vector.multi_reduction <add>, %338, %cst_47 [2] : vector<8x8x32xf32> to vector<8x8xf32>
    %340 = vector.shape_cast %339 : vector<8x8xf32> to vector<8x8x1xf32>
    %341 = arith.addf %335, %340 : vector<8x8x1xf32>
    %cst_48 = arith.constant dense<0xFF800000> : vector<8x1xf32>
    %342 = vector.multi_reduction <maximumf>, %341, %cst_48 [0] : vector<8x8x1xf32> to vector<8x1xf32>
    %343 = vector.shape_cast %342 : vector<8x1xf32> to vector<1x8x1xf32>
    %344 = vector.broadcast %343 : vector<1x8x1xf32> to vector<8x8x1xf32>
    %345 = arith.subf %341, %344 : vector<8x8x1xf32>
    %346 = math.exp %345 : vector<8x8x1xf32>
    %cst_49 = arith.constant dense<0.000000e+00> : vector<8x1xf32>
    %347 = vector.multi_reduction <add>, %346, %cst_49 [0] : vector<8x8x1xf32> to vector<8x1xf32>
    %348 = vector.shape_cast %347 : vector<8x1xf32> to vector<1x8x1xf32>
    %349 = vector.broadcast %348 : vector<1x8x1xf32> to vector<8x8x1xf32>
    %350 = arith.divf %346, %349 : vector<8x8x1xf32>
    %351 = vector.broadcast %350 : vector<8x8x1xf32> to vector<8x8x32xf32>
    %352 = arith.mulf %321, %351 : vector<8x8x32xf32>
    %cst_50 = arith.constant dense<0.000000e+00> : vector<8x32xf32>
    %353 = vector.multi_reduction <add>, %352, %cst_50 [0] : vector<8x8x32xf32> to vector<8x32xf32>
    %354 = vector.broadcast %350 : vector<8x8x1xf32> to vector<8x8x32xf32>
    %355 = arith.mulf %330, %354 : vector<8x8x32xf32>
    %cst_51 = arith.constant dense<0.000000e+00> : vector<8x32xf32>
    %356 = vector.multi_reduction <add>, %355, %cst_51 [0] : vector<8x8x32xf32> to vector<8x32xf32>
    %c0_52 = arith.constant 0 : index
    %c0_53 = arith.constant 0 : index
    %357 = vector.load %arg6[%c0_52, %c0_53] : memref<64x8xf32, #tpu.memory_space<vmem>>, vector<32x8xf32>
    %cst_54 = arith.constant dense<0.000000e+00> : vector<8x8xf32>
    %358 = tpu.matmul %353, %357, %cst_54 {dimension_numbers = #tpu.dot_dimension_numbers<[1], [0], [0], [1], [0, 0, 1, 1], [], []>} : vector<8x32xf32>, vector<32x8xf32>, vector<8x8xf32> -> vector<8x8xf32>
    %c32 = arith.constant 32 : index
    %c0_55 = arith.constant 0 : index
    %359 = vector.load %arg6[%c32, %c0_55] : memref<64x8xf32, #tpu.memory_space<vmem>>, vector<32x8xf32>
    %cst_56 = arith.constant dense<0.000000e+00> : vector<8x8xf32>
    %360 = tpu.matmul %356, %359, %cst_56 {dimension_numbers = #tpu.dot_dimension_numbers<[1], [0], [0], [1], [0, 0, 1, 1], [], []>} : vector<8x32xf32>, vector<32x8xf32>, vector<8x8xf32> -> vector<8x8xf32>
    %361 = arith.addf %358, %360 : vector<8x8xf32>
    %c0_57 = arith.constant 0 : index
    %c0_58 = arith.constant 0 : index
    %362 = vector.load %arg7[%c0_57, %c0_58] : memref<1x8xf32, #tpu.memory_space<vmem>>, vector<1x8xf32>
    %363 = vector.broadcast %362 : vector<1x8xf32> to vector<8x8xf32>
    %364 = arith.addf %361, %363 : vector<8x8xf32>
    %365 = vector.extract_strided_slice %364 {offsets = [0, 0], sizes = [2, 8], strides = [1, 1]} : vector<8x8xf32> to vector<2x8xf32>
    %c0_59 = arith.constant 0 : index
    %c0_60 = arith.constant 0 : index
    %366 = vector.load %arg8[%c0_59, %c0_60] : memref<2x8xf32, #tpu.memory_space<vmem>>, vector<2x8xf32>
    tpu.vector_store %arg8[%c0_59, %c0_60], %365 {strides = array<i32>} : memref<2x8xf32, #tpu.memory_space<vmem>>, vector<2x8xf32>,
    return
  }
}

</mosaic_0001>

<bundles_post_ra>
// kernel: tpu_custom_call.1
= control target key start
LH: loop header
LB: loop body
LE: loop exit
PB: predicated region body
PF: predicated region fallthrough
CT: control target
= control target key end

     0   :  { %vm120_vm0 = vcmask 1041408   ;;  %v2977_v2 = vmov 0   ;;  %v2978_v7 = vmov 0.0   ;;  %s3688_s0 = inlined_call_operand.vmem [shape: s32[64,1], index: 0, kind: input, shape index: {}]   ;;  %s3689_s1 = inlined_call_operand.vmem [shape: f32[50,32], index: 1, kind: input, shape index: {}]   ;;  %s3690_s2 = inlined_call_operand.vmem [shape: f32[32,256], index: 2, kind: input, shape index: {}]   ;;  %s3691_s3 = inlined_call_operand.vmem [shape: f32[1,256], index: 3, kind: input, shape index: {}]   ;;  %s3692_s4 = inlined_call_operand.vmem [shape: f32[32,128], index: 4, kind: input, shape index: {}]   ;;  %s3693_s5 = inlined_call_operand.vmem [shape: f32[32,128], index: 5, kind: input, shape index: {}]   ;;  %s3694_s6 = inlined_call_operand.vmem [shape: f32[64,8], index: 6, kind: input, shape index: {}]   ;;  %s3695_s7 = inlined_call_operand.vmem [shape: f32[1,8], index: 7, kind: input, shape index: {}]   ;;  %s3696_s8 = inlined_call_operand.hbm [shape: f32[2,8], index: 8, kind: output, shape index: {}]  }
   0x1   :  { %v32_v0 = vld [vmem:[%s3688_s0 + $0x10] sm:$0xff]  ;;  %v30_v1 = vld [vmem:[%s3688_s0] sm:$0xff]  ;;  %2805 = vset.pattern.permute.xlu1 %v2977_v2  ;;  %2804 = vset.pattern.permute.xlu0 %v2977_v2  ;;  %v33_v4 = vld [vmem:[%s3688_s0 + $0x18] sm:$0xff] }
   0x2   :  { %47 = vperm.xlu1 %2805, %v32_v0   ;;  %41 = vperm.xlu0 %2804, %v30_v1   ;;  %v94_v3 = vld [vmem:[%s3689_s1 + $0x30] sm:$0x3]  ;;  %v31_v5 = vld [vmem:[%s3688_s0 + $0x8] sm:$0xff]  ;;  %v92_v8 = vld [vmem:[%s3689_s1 + $0x20] sm:$0xff] }
   0x3   :  { %2574 = vmatprep.subr.msk.mxu0 %vm120_vm0, %v94_v3  ;;  %v93_v6 = vld [vmem:[%s3689_s1 + $0x28] sm:$0xff]  ;;  %338 = vmatprep.mubr.f32.mxu1 %v2978_v7 }
   0x4   :  { %2575 = vmatpush3.msk.msra.mxu0 %vm120_vm0, %v94_v3 }
   0x5   :  { %2576 = vmatprep.subr.mxu0 %v93_v6 }
   0x6   :  { %13 = vsyncpa [#allocation3], 0  ;;  %50 = vperm.xlu1 %2805, %v33_v4   ;;  %44 = vperm.xlu0 %2804, %v31_v5   ;;  %v35_v9 = vld [vmem:[%s3688_s0 + $0x28] sm:$0xff]  ;;  %v34_v10 = vld [vmem:[%s3688_s0 + $0x20] sm:$0xff]  ;;  %v38_v22 = vlaneseq  ;;  %vm95_vm1 = vcmask 408576   ;;  %vm2979_vm10 = vmmov 0  }
   0x7   :  { %2577 = vmatpush3.msra.mxu0 %v93_v6  ;;  %v91_v11 = vld [vmem:[%s3689_s1 + $0x18] sm:$0xff]  ;;  %v90_v12 = vld [vmem:[%s3689_s1 + $0x10] sm:$0xff]  ;;  %v89_v15 = vld [vmem:[%s3689_s1 + $0x8] sm:$0xff]  ;;  %vm249_vm11 = vcmask 261120   ;;  %vm1991_vm12 = vcmask 1040384   ;;  %vm2190_vm13 = vcmask 1048320  }
   0x8   :  { %2578 = vmatprep.subr.mxu0 %v92_v8  ;;  %v37_v13 = vld [vmem:[%s3688_s0 + $0x38] sm:$0xff]  ;;  %v36_v14 = vld [vmem:[%s3688_s0 + $0x30] sm:$0xff]  ;;  %v88_v16 = vld [vmem:[%s3689_s1] sm:$0xff]  ;;  %v39_v23 = vand.u32 127, %v38_v22  ;;  %v240_v63 = vshrl.u32 %v38_v22, 7  ;;  %s2981_s1 = smov 32  }
   0x9   :  { %2579 = vmatpush3.msra.mxu0 %v92_v8  ;;  %v236_v17 = vld [vmem:[%s3690_s2 + $0x38] sm:$0xff]  ;;  %v235_v18 = vld [vmem:[%s3690_s2 + $0x30] sm:$0xff]  ;;  %v234_v19 = vld [vmem:[%s3690_s2 + $0x28] sm:$0xff]  ;;  %s2982_s18 = smov [#allocation2]   ;;  %vm2395_vm14 = vcmask 58368  }
   0xa   :  { %56 = vperm.xlu1 %2805, %v35_v9   ;;  %53 = vperm.xlu0 %2804, %v34_v10   ;;  %v233_v20 = vld [vmem:[%s3690_s2 + $0x20] sm:$0xff]  ;;  %v232_v21 = vld [vmem:[%s3690_s2 + $0x18] sm:$0xff]  ;;  %v231_v41 = vld [vmem:[%s3690_s2 + $0x10] sm:$0xff]  ;;  %v241_v0 = vsub.s32 0, %v240_v63  ;;  %v245_v2 = vsub.s32 1, %v240_v63 }
   0xb   :  { %2580 = vmatprep.subr.mxu0 %v91_v11  ;;  %298 = vmatprep.subr.mxu1 %v236_v17  ;;  %v3099_v30 = vld [vmem:[%s3692_s4 + $0x18] sm:$0xff]  ;;  %v3122_v42 = vld [vmem:[%s3692_s4 + $0x10] sm:$0xff]  ;;  %v230_v43 = vld [vmem:[%s3690_s2 + $0x8] sm:$0xff] }
   0xc   :  { %2581 = vmatpush3.msra.mxu0 %v91_v11  ;;  %299 = vmatpush1.msra.mxu1 %v235_v18  ;;  %v229_v44 = vld [vmem:[%s3690_s2] sm:$0xff]  ;;  %v3135_v45 = vld [vmem:[%s3692_s4 + $0x8] sm:$0xff]  ;;  %v3155_v47 = vld [vmem:[%s3693_s5 + $0x18] sm:$0xff] }
   0xd   :  { %2582 = vmatprep.subr.mxu0 %v90_v12  ;;  %300 = vmatprep.subr.mxu1 %v234_v19  ;;  %v3142_v46 = vld [vmem:[%s3692_s4] sm:$0xff]  ;;  %v3162_v48 = vld [vmem:[%s3693_s5 + $0x10] sm:$0xff]  ;;  %v3168_v49 = vld [vmem:[%s3693_s5 + $0x8] sm:$0xff] }
   0xe   :  { %62 = vperm.xlu1 %2805, %v37_v13   ;;  %59 = vperm.xlu0 %2804, %v36_v14   ;;  %v3176_v50 = vld [vmem:[%s3693_s5] sm:$0xff]  ;;  %s2403_s5 = sshll.u32 %s2982_s18, 4  ;;  %s2404_s5 = int_to_ptr.vmem [resolvable:$true] %s2403_s5 }
   0xf   :  { %2583 = vmatpush3.msra.mxu0 %v90_v12  ;;  %301 = vmatpush1.msra.mxu1 %v233_v20  ;;  %v237_v1 = vld [vmem:[%s3691_s3] sm:$0x3]  ;;  %s2980_s3 = smov 64   ;;  %s2955_s19 = scalar_lea.vmem %s2404_s5, 32 }
  0x10   :  { %2584 = vmatprep.subr.mxu0 %v89_v15  ;;  %302 = vmatprep.subr.mxu1 %v232_v21  ;;  %v242_v3 = vrot.slane %v237_v1, %v241_v0  ;;  %v246_v4 = vrot.slane %v237_v1, %v245_v2  ;;  %p2956_p0 = scmp.ne.s32.totalorder %s2404_s5, %s2955_s19  ;;  %p2960_p1 = scmp.lt.s32.totalorder %s2404_s5, %s2404_s5 }
  0x11   :  { %2585 = vmatpush3.msra.mxu0 %v89_v15  ;;  %303 = vmatpush1.msra.mxu1 %v231_v41  ;;  %p2961_p2 = scmp.lt.s32.totalorder %s2955_s19, %s2955_s19 }
  0x12   :  { %2586 = vmatprep.subr.mxu0 %v88_v16  ;;  %304 = vmatprep.subr.mxu1 %v230_v43 }
  0x13   :  { %2587 = vmatpush3.msra.mxu0 %v88_v16  ;;  %305 = vmatpush1.msra.mxu1 %v229_v44  ;;  %p2962_p3 = por %p2961_p2, %p2960_p1 }
  0x14   :  { %2600 = vmatprep.subr.mxu0 %v2978_v7  ;;  %2622 = vmatprep.subr.mxu1 %v2978_v7 }
  0x15   :  { %p2963_p4 = pnand %p2962_p3, %p2956_p0 }
  0x7d   :  { %v48_v24 = vpop.permute.xlu1 %47  ;;  %v42_v25 = vpop.permute.xlu0 %41 }
  0x7e   :  { %vm64_vm2 = vcmp.eq.s32.totalorder %v42_v25, %v39_v23  ;;  %vm66_vm3 = vcmp.eq.s32.totalorder %v48_v24, %v39_v23 }
  0x7f   :  { %v2411_v26 = vsel %vm64_vm2, 1.0, %v2978_v7  ;;  %v2413_v29 = vsel %vm66_vm3, 1.0, %v2978_v7 }
  0x80   :  { %2588 = vmatprep.mubr.msk.f32.mxu0 %vm95_vm1, %v2411_v26 }
  0x81   :  { %v51_v27 = vpop.permute.xlu1 %50  ;;  %v45_v28 = vpop.permute.xlu0 %44 }
  0x82   :  { %vm67_vm4 = vcmp.eq.s32.totalorder %v51_v27, %v39_v23  ;;  %vm65_vm5 = vcmp.eq.s32.totalorder %v45_v28, %v39_v23 }
  0x83   :  { %v2412_v31 = vsel %vm65_vm5, 1.0, %v2978_v7  ;;  %v2414_v32 = vsel %vm67_vm4, 1.0, %v2978_v7 }
  0x84   :  { %2589 = vmatmul.mubr.msk.f32.vlgmr.msra.gmra.mxu0 %vm95_vm1, %v2412_v31 }
  0x85   :  { %v57_v33 = vpop.permute.xlu1 %56  ;;  %v54_v34 = vpop.permute.xlu0 %53  ;;  %2591 = vmatprep.mubr.msk.f32.mxu0 %vm95_vm1, %v2413_v29  ;;  %2601 = vmatpush3.msra.mxu0 %v3099_v30 }
  0x86   :  { %vm68_vm6 = vcmp.eq.s32.totalorder %v54_v34, %v39_v23  ;;  %2602 = vmatprep.subr.mxu0 %v2978_v7  ;;  %vm69_vm7 = vcmp.eq.s32.totalorder %v57_v33, %v39_v23 }
  0x87   :  { %v2415_v35 = vsel %vm68_vm6, 1.0, %v2978_v7  ;;  %v2416_v38 = vsel %vm69_vm7, 1.0, %v2978_v7  ;;  %2603 = vmatpush3.msra.mxu0 %v3122_v42 }
  0x88   :  { %2592 = vmatmul.mubr.msk.f32.gmra.mxu0 %vm95_vm1, %v2414_v32  ;;  %2604 = vmatprep.subr.mxu0 %v2978_v7 }
  0x89   :  { %v63_v36 = vpop.permute.xlu1 %62  ;;  %2594 = vmatprep.mubr.msk.f32.mxu0 %vm95_vm1, %v2415_v35  ;;  %v60_v37 = vpop.permute.xlu0 %59  ;;  %2605 = vmatpush3.msra.mxu0 %v3135_v45 }
  0x8a   :  { %vm70_vm8 = vcmp.eq.s32.totalorder %v60_v37, %v39_v23  ;;  %vm71_vm9 = vcmp.eq.s32.totalorder %v63_v36, %v39_v23  ;;  %2606 = vmatprep.subr.mxu0 %v2978_v7 }
  0x8b   :  { %v2417_v39 = vsel %vm70_vm8, 1.0, %v2978_v7  ;;  %v2418_v40 = vsel %vm71_vm9, 1.0, %v2978_v7  ;;  %2607 = vmatpush3.msra.mxu0 %v3142_v46 }
  0x8c   :  { %2595 = vmatmul.mubr.msk.f32.gmra.mxu0 %vm95_vm1, %v2416_v38  ;;  %2611 = vmatprep.subr.mxu0 %v2978_v7 }
  0x8d   :  { %2597 = vmatprep.mubr.msk.f32.mxu0 %vm95_vm1, %v2417_v39 }
  0x90   :  { %2598 = vmatmul.mubr.msk.f32.gmra.mxu0 %vm95_vm1, %v2418_v40 }
  0x91   :  { %2608 = vmatprep.mubr.msk.f32.mxu0 %vm2979_vm10, %v2978_v7 }
  0x94   :  { %2609 = vmatmul.mubr.f32.vlgmr.msra.gmra.mxu0 %v2978_v7 }
  0x95   :  { %2619 = vmatprep.mubr.msk.f32.mxu0 %vm2979_vm10, %v2978_v7  ;;  %2612 = vmatpush3.msra.mxu0 %v3155_v47 }
  0x96   :  { %2613 = vmatprep.subr.mxu0 %v2978_v7 }
  0x97   :  { %2614 = vmatpush3.msra.mxu0 %v3162_v48 }
  0x98   :  { %2615 = vmatprep.subr.mxu0 %v2978_v7 }
  0x99   :  { %2616 = vmatpush3.msra.mxu0 %v3168_v49 }
  0x9a   :  { %2617 = vmatprep.subr.mxu0 %v2978_v7 }
  0x9b   :  { %2618 = vmatpush3.msra.mxu0 %v3176_v50 }
  0x9c   :  { %2620 = vmatmul.mubr.f32.vlgmr.msra.gmra.mxu0 %v2978_v7  ;;  %2633 = vmatprep.subr.mxu0 %v2978_v7 }
  0x9d   :  { %2634 = vmatpush3.msra.mxu0 %v3155_v47  ;;  %2641 = vmatprep.mubr.msk.f32.mxu0 %vm2979_vm10, %v2978_v7 }
  0x9e   :  { %2635 = vmatprep.subr.mxu0 %v2978_v7 }
  0x9f   :  { %2636 = vmatpush3.msra.mxu0 %v3162_v48 }
  0xa0   :  { %2637 = vmatprep.subr.mxu0 %v2978_v7 }
  0xa1   :  { %2638 = vmatpush3.msra.mxu0 %v3168_v49 }
  0xa2   :  { %2639 = vmatprep.subr.mxu0 %v2978_v7 }
  0xa3   :  { %2640 = vmatpush3.msra.mxu0 %v3176_v50 }
  0xa4   :  { %2655 = vmatprep.subr.mxu0 %v2978_v7 }
 0x144   :  { %v2590_v51 = vpop.f32.mrf.mxu0 }
 0x146   :  { %v190_v52 = vpop.f32.mrf.mxu0 }
 0x147   :  { %2428 = vmatmul.mubr.msk.f32.vlgmr.msra.gmra.mxu1 %vm249_vm11, %v190_v52 }
 0x148   :  { %344 = vmatprep.mubr.f32.mxu1 %v2978_v7  ;;  %2623 = vmatpush3.msra.mxu1 %v3099_v30  ;;  %v2593_v53 = vpop.f32.mrf.mxu0 }
 0x149   :  { %2624 = vmatprep.subr.mxu1 %v2978_v7 }
 0x14a   :  { %2625 = vmatpush3.msra.mxu1 %v3122_v42  ;;  %v200_v54 = vpop.f32.mrf.mxu0 }
 0x14b   :  { %2429 = vmatmul.mubr.msk.f32.gmra.mxu1 %vm249_vm11, %v2590_v51  ;;  %2626 = vmatprep.subr.mxu1 %v2978_v7 }
 0x14c   :  { %350 = vmatprep.mubr.f32.mxu1 %v2978_v7  ;;  %2627 = vmatpush3.msra.mxu1 %v3135_v45  ;;  %v2596_v55 = vpop.f32.mrf.mxu0 }
 0x14d   :  { %2628 = vmatprep.subr.mxu1 %v2978_v7 }
 0x14e   :  { %2629 = vmatpush3.msra.mxu1 %v3142_v46  ;;  %v210_v56 = vpop.f32.mrf.mxu0 }
 0x14f   :  { %2430 = vmatmul.mubr.msk.f32.gmra.mxu1 %vm249_vm11, %v200_v54  ;;  %2644 = vmatprep.subr.mxu1 %v2978_v7 }
 0x150   :  { %356 = vmatprep.mubr.f32.mxu1 %v2978_v7  ;;  %v2599_v57 = vpop.f32.mrf.mxu0 }
 0x152   :  { %v220_v58 = vpop.f32.mrf.mxu0 }
 0x153   :  { %2431 = vmatmul.mubr.msk.f32.gmra.mxu1 %vm249_vm11, %v2593_v53 }
 0x154   :  { %362 = vmatprep.mubr.f32.mxu1 %v2978_v7  ;;  %v464_v59 = vpop.f32.mrf.mxu0 }
 0x156   :  { %v2610_v60 = vpop.f32.mrf.mxu0 }
 0x157   :  { %2432 = vmatmul.mubr.msk.f32.gmra.mxu1 %vm249_vm11, %v210_v56 }
 0x158   :  { %368 = vmatprep.mubr.f32.mxu1 %v2978_v7 }
 0x15b   :  { %2433 = vmatmul.mubr.msk.f32.gmra.mxu1 %vm249_vm11, %v2596_v55 }
 0x15c   :  { %374 = vmatprep.mubr.f32.mxu1 %v2978_v7  ;;  %v559_v61 = vpop.f32.mrf.mxu0 }
 0x15e   :  { %v2621_v62 = vpop.f32.mrf.mxu0 }
 0x15f   :  { %2434 = vmatmul.mubr.msk.f32.gmra.mxu1 %vm249_vm11, %v220_v58 }
 0x160   :  { %380 = vmatprep.mubr.f32.mxu1 %v2978_v7 }
 0x163   :  { %2435 = vmatmul.mubr.msk.f32.gmra.mxu1 %vm249_vm11, %v2599_v57 }
 0x164   :  { %2630 = vmatprep.mubr.msk.f32.mxu1 %vm2979_vm10, %v2978_v7 }
 0x207   :  { %v340_v5 = vpop.f32.mrf.mxu1 }
 0x208   :  { %v341_v6 = vadd.f32 %v340_v5, %v242_v3 }
 0x209   :  { %v342_v8 = vpop.f32.mrf.mxu1 }
 0x20a   :  { %v3220_v9 = vadd.f32 %v342_v8, %v246_v4  ;;  %v468_v10 = vadd.f32 %v464_v59, %v341_v6 }
 0x20b   :  { %v346_v11 = vpop.f32.mrf.mxu1 }
 0x20c   :  { %2806 = vtanh.f32 %v468_v10  ;;  %v3222_v12 = vadd.f32 %v346_v11, %v242_v3  ;;  %v2436_v44 = vmul.f32 -1.442695, %v468_v10 }
 0x20d   :  { %v348_v13 = vpop.f32.mrf.mxu1 }
 0x20e   :  { %v3224_v14 = vadd.f32 %v348_v13, %v246_v4 }
 0x20f   :  { %v352_v15 = vpop.f32.mrf.mxu1 }
 0x210   :  { %v3226_v16 = vadd.f32 %v352_v15, %v242_v3 }
 0x211   :  { %v354_v17 = vpop.f32.mrf.mxu1 }
 0x212   :  { %v3228_v18 = vadd.f32 %v354_v17, %v246_v4 }
 0x213   :  { %v358_v19 = vpop.f32.mrf.mxu1 }
 0x214   :  { %v3230_v20 = vadd.f32 %v358_v19, %v242_v3 }
 0x215   :  { %v360_v21 = vpop.f32.mrf.mxu1 }
 0x216   :  { %v3232_v22 = vadd.f32 %v360_v21, %v246_v4 }
 0x217   :  { %v364_v23 = vpop.f32.mrf.mxu1 }
 0x218   :  { %v3234_v24 = vadd.f32 %v364_v23, %v242_v3 }
 0x219   :  { %v2807_v25 = vpop.eup %2806  ;;  %v366_v26 = vpop.f32.mrf.mxu1 }
 0x21a   :  { %v3236_v27 = vadd.f32 %v366_v26, %v246_v4  ;;  %478 = vrot.lane.b32.xlu0 %v2807_v25, %s2980_s3 }
 0x21b   :  { %v370_v28 = vpop.f32.mrf.mxu1 }
 0x21c   :  { %v3239_v29 = vadd.f32 %v370_v28, %v242_v3 }
 0x21d   :  { %v372_v31 = vpop.f32.mrf.mxu1 }
 0x21e   :  { %v3241_v32 = vadd.f32 %v372_v31, %v246_v4 }
 0x21f   :  { %v376_v33 = vpop.f32.mrf.mxu1 }
 0x220   :  { %v3243_v34 = vadd.f32 %v376_v33, %v242_v3 }
 0x221   :  { %v378_v35 = vpop.f32.mrf.mxu1 }
 0x222   :  { %v3245_v36 = vadd.f32 %v378_v35, %v246_v4 }
 0x223   :  { %v382_v37 = vpop.f32.mrf.mxu1 }
 0x224   :  { %v3247_v38 = vadd.f32 %v382_v37, %v242_v3 }
 0x225   :  { %v384_v39 = vpop.f32.mrf.mxu1 }
 0x226   :  { %v385_v40 = vadd.f32 %v384_v39, %v246_v4 }
 0x228   :  { %v563_v41 = vadd.f32 %v559_v61, %v385_v40 }
 0x22a   :  { %2808 = vtanh.f32 %v563_v41  ;;  %v2437_v53 = vmul.f32 -1.442695, %v563_v41 }
 0x22b   :  { %2810 = vpow2.f32 %v2436_v44 }
 0x237   :  { %v2809_v43 = vpop.eup %2808 }
 0x238   :  { %573 = vrot.lane.b32.xlu1 %v2809_v43, %s2980_s3  ;;  %v2811_v51 = vpop.eup %2810 }
 0x239   :  { %v472_v52 = vadd.f32 1.0, %v2811_v51 }
 0x23b   :  { %2812 = vrcp.f32 %v472_v52 }
 0x23c   :  { %2814 = vpow2.f32 %v2437_v53 }
 0x248   :  { %v2813_v54 = vpop.eup %2812 }
 0x249   :  { %v2815_v57 = vpop.eup %2814  ;;  %v476_v62 = vmul.f32 0.0, %v2813_v54 }
 0x24a   :  { %v567_v58 = vadd.f32 1.0, %v2815_v57 }
 0x24c   :  { %2816 = vrcp.f32 %v567_v58 }
 0x259   :  { %v2817_v59 = vpop.eup %2816 }
 0x25a   :  { %v571_v2 = vmul.f32 0.0, %v2817_v59 }
 0x28c   :  { %v479_v55 = vpop.permute.xlu0 %478 }
 0x28d   :  { %v481_v56 = vmul.f32 %v2813_v54, %v479_v55 }
 0x28f   :  { %483 = vrot.lane.b32.xlu0 %v481_v56, %s2981_s1 }
 0x2aa   :  { %v574_v60 = vpop.permute.xlu1 %573 }
 0x2ab   :  { %v576_v61 = vmul.f32 %v2817_v59, %v574_v60 }
 0x2ad   :  { %578 = vrot.lane.b32.xlu1 %v576_v61, %s2981_s1 }
 0x301   :  { %v484_v63 = vpop.permute.xlu0 %483 }
 0x302   :  { %v3252_v0 = vadd.f32 %v484_v63, %v476_v62 }
 0x304   :  { %2818 = vtanh.f32 %v3252_v0 }
 0x311   :  { %v2819_v1 = vpop.eup %2818 }
 0x312   :  { %489 = vrot.lane.b32.xlu0 %v2819_v1, %s2980_s3 }
 0x31f   :  { %v579_v3 = vpop.permute.xlu1 %578 }
 0x320   :  { %v3256_v4 = vadd.f32 %v579_v3, %v571_v2 }
 0x322   :  { %2820 = vtanh.f32 %v3256_v4 }
 0x32f   :  { %v2821_v5 = vpop.eup %2820 }
 0x330   :  { %584 = vrot.lane.b32.xlu1 %v2821_v5, %s2980_s3 }
 0x384   :  { %v490_v6 = vpop.permute.xlu0 %489 }
 0x385   :  { %v3260_v8 = vmul.f32 %v2813_v54, %v490_v6 }
 0x387   :  { %589 = vrot.lane.b32.xlu0 %v3260_v8, %s2981_s1 }
 0x3a2   :  { %v585_v10 = vpop.permute.xlu1 %584 }
 0x3a3   :  { %v3264_v11 = vmul.f32 %v2817_v59, %v585_v10 }
 0x3a5   :  { %689 = vrot.lane.b32.xlu1 %v3264_v11, %s2981_s1 }
 0x3f9   :  { %v590_v13 = vpop.permute.xlu0 %589 }
 0x3fa   :  { %2631 = vmatmul.mubr.msk.f32.vlgmr.msra.gmra.mxu1 %vm249_vm11, %v590_v13 }
 0x3fb   :  { %2645 = vmatpush3.msra.mxu1 %v3099_v30  ;;  %2652 = vmatprep.mubr.msk.f32.mxu1 %vm2979_vm10, %v2978_v7 }
 0x3fc   :  { %2646 = vmatprep.subr.mxu1 %v2978_v7 }
 0x3fd   :  { %2647 = vmatpush3.msra.mxu1 %v3122_v42 }
 0x3fe   :  { %2648 = vmatprep.subr.mxu1 %v2978_v7 }
 0x3ff   :  { %2649 = vmatpush3.msra.mxu1 %v3135_v45 }
 0x400   :  { %2650 = vmatprep.subr.mxu1 %v2978_v7 }
 0x401   :  { %2651 = vmatpush3.msra.mxu1 %v3142_v46 }
 0x402   :  { %2666 = vmatprep.subr.mxu1 %v2978_v7 }
 0x417   :  { %v690_v15 = vpop.permute.xlu1 %689 }
 0x418   :  { %2642 = vmatmul.mubr.msk.f32.vlgmr.msra.gmra.mxu0 %vm249_vm11, %v690_v15 }
 0x419   :  { %2656 = vmatpush3.msra.mxu0 %v3155_v47  ;;  %2663 = vmatprep.mubr.msk.f32.mxu0 %vm2979_vm10, %v2978_v7 }
 0x41a   :  { %2657 = vmatprep.subr.mxu0 %v2978_v7 }
 0x41b   :  { %2658 = vmatpush3.msra.mxu0 %v3162_v48 }
 0x41c   :  { %2659 = vmatprep.subr.mxu0 %v2978_v7 }
 0x41d   :  { %2660 = vmatpush3.msra.mxu0 %v3168_v49 }
 0x41e   :  { %2661 = vmatprep.subr.mxu0 %v2978_v7 }
 0x41f   :  { %2662 = vmatpush3.msra.mxu0 %v3176_v50 }
 0x420   :  { %2677 = vmatprep.subr.mxu0 %v2978_v7 }
 0x4ba   :  { %v659_v17 = vpop.f32.mrf.mxu1 }
 0x4bb   :  { %v663_v19 = vadd.f32 %v659_v17, %v3222_v12 }
 0x4bc   :  { %v2632_v21 = vpop.f32.mrf.mxu1 }
 0x4bd   :  { %2822 = vtanh.f32 %v663_v19  ;;  %v2439_v33 = vmul.f32 -1.442695, %v663_v19 }
 0x4ca   :  { %v2823_v23 = vpop.eup %2822 }
 0x4cb   :  { %673 = vrot.lane.b32.xlu0 %v2823_v23, %s2980_s3 }
 0x4d8   :  { %v759_v25 = vpop.f32.mrf.mxu0 }
 0x4d9   :  { %v763_v26 = vadd.f32 %v759_v25, %v3245_v36 }
 0x4da   :  { %v2643_v28 = vpop.f32.mrf.mxu0 }
 0x4db   :  { %2824 = vtanh.f32 %v763_v26  ;;  %v2441_v39 = vmul.f32 -1.442695, %v763_v26 }
 0x4dc   :  { %2826 = vpow2.f32 %v2439_v33 }
 0x4e8   :  { %v2825_v31 = vpop.eup %2824 }
 0x4e9   :  { %773 = vrot.lane.b32.xlu1 %v2825_v31, %s2980_s3  ;;  %v2827_v35 = vpop.eup %2826 }
 0x4ea   :  { %v667_v37 = vadd.f32 1.0, %v2827_v35 }
 0x4ec   :  { %2828 = vrcp.f32 %v667_v37 }
 0x4ed   :  { %2830 = vpow2.f32 %v2441_v39 }
 0x4f9   :  { %v2829_v12 = vpop.eup %2828 }
 0x4fa   :  { %v2831_v43 = vpop.eup %2830  ;;  %v671_v53 = vmul.f32 %v2829_v12, %v3252_v0 }
 0x4fb   :  { %v767_v44 = vadd.f32 1.0, %v2831_v43 }
 0x4fd   :  { %2832 = vrcp.f32 %v767_v44 }
 0x50a   :  { %v2833_v36 = vpop.eup %2832 }
 0x50b   :  { %v771_v57 = vmul.f32 %v2833_v36, %v3256_v4 }
 0x53d   :  { %v674_v40 = vpop.permute.xlu0 %673 }
 0x53e   :  { %v676_v41 = vmul.f32 %v2829_v12, %v674_v40 }
 0x540   :  { %678 = vrot.lane.b32.xlu0 %v676_v41, %s2981_s1 }
 0x55b   :  { %v774_v51 = vpop.permute.xlu1 %773 }
 0x55c   :  { %v776_v52 = vmul.f32 %v2833_v36, %v774_v51 }
 0x55e   :  { %778 = vrot.lane.b32.xlu1 %v776_v52, %s2981_s1 }
 0x5b2   :  { %v679_v54 = vpop.permute.xlu0 %678 }
 0x5b3   :  { %v3297_v55 = vadd.f32 %v679_v54, %v671_v53 }
 0x5b5   :  { %2834 = vtanh.f32 %v3297_v55 }
 0x5c2   :  { %v2835_v56 = vpop.eup %2834 }
 0x5c3   :  { %684 = vrot.lane.b32.xlu0 %v2835_v56, %s2980_s3 }
 0x5d0   :  { %v779_v58 = vpop.permute.xlu1 %778 }
 0x5d1   :  { %v3302_v59 = vadd.f32 %v779_v58, %v771_v57 }
 0x5d3   :  { %2836 = vtanh.f32 %v3302_v59 }
 0x5e0   :  { %v2837_v60 = vpop.eup %2836 }
 0x5e1   :  { %784 = vrot.lane.b32.xlu1 %v2837_v60, %s2980_s3 }
 0x635   :  { %v685_v61 = vpop.permute.xlu0 %684 }
 0x636   :  { %v3306_v62 = vmul.f32 %v2829_v12, %v685_v61 }
 0x638   :  { %789 = vrot.lane.b32.xlu0 %v3306_v62, %s2981_s1 }
 0x653   :  { %v785_v63 = vpop.permute.xlu1 %784 }
 0x654   :  { %v3310_v0 = vmul.f32 %v2833_v36, %v785_v63 }
 0x656   :  { %889 = vrot.lane.b32.xlu1 %v3310_v0, %s2981_s1 }
 0x6aa   :  { %v790_v1 = vpop.permute.xlu0 %789 }
 0x6ab   :  { %2653 = vmatmul.mubr.msk.f32.vlgmr.msra.gmra.mxu1 %vm249_vm11, %v790_v1 }
 0x6ac   :  { %2667 = vmatpush3.msra.mxu1 %v3099_v30  ;;  %2674 = vmatprep.mubr.msk.f32.mxu1 %vm2979_vm10, %v2978_v7 }
 0x6ad   :  { %2668 = vmatprep.subr.mxu1 %v2978_v7 }
 0x6ae   :  { %2669 = vmatpush3.msra.mxu1 %v3122_v42 }
 0x6af   :  { %2670 = vmatprep.subr.mxu1 %v2978_v7 }
 0x6b0   :  { %2671 = vmatpush3.msra.mxu1 %v3135_v45 }
 0x6b1   :  { %2672 = vmatprep.subr.mxu1 %v2978_v7 }
 0x6b2   :  { %2673 = vmatpush3.msra.mxu1 %v3142_v46 }
 0x6b3   :  { %2688 = vmatprep.subr.mxu1 %v2978_v7 }
 0x6c8   :  { %v890_v2 = vpop.permute.xlu1 %889 }
 0x6c9   :  { %2664 = vmatmul.mubr.msk.f32.vlgmr.msra.gmra.mxu0 %vm249_vm11, %v890_v2 }
 0x6ca   :  { %2678 = vmatpush3.msra.mxu0 %v3155_v47  ;;  %2685 = vmatprep.mubr.msk.f32.mxu0 %vm2979_vm10, %v2978_v7 }
 0x6cb   :  { %2679 = vmatprep.subr.mxu0 %v2978_v7 }
 0x6cc   :  { %2680 = vmatpush3.msra.mxu0 %v3162_v48 }
 0x6cd   :  { %2681 = vmatprep.subr.mxu0 %v2978_v7 }
 0x6ce   :  { %2682 = vmatpush3.msra.mxu0 %v3168_v49 }
 0x6cf   :  { %2683 = vmatprep.subr.mxu0 %v2978_v7 }
 0x6d0   :  { %2684 = vmatpush3.msra.mxu0 %v3176_v50 }
 0x6d1   :  { %2699 = vmatprep.subr.mxu0 %v2978_v7 }
 0x76b   :  { %v859_v3 = vpop.f32.mrf.mxu1 }
 0x76c   :  { %v863_v4 = vadd.f32 %v859_v3, %v3226_v16 }
 0x76d   :  { %v2654_v5 = vpop.f32.mrf.mxu1 }
 0x76e   :  { %2838 = vtanh.f32 %v863_v4  ;;  %v2443_v19 = vmul.f32 -1.442695, %v863_v4 }
 0x77b   :  { %v2839_v6 = vpop.eup %2838 }
 0x77c   :  { %873 = vrot.lane.b32.xlu0 %v2839_v6, %s2980_s3 }
 0x789   :  { %v959_v10 = vpop.f32.mrf.mxu0 }
 0x78a   :  { %v963_v13 = vadd.f32 %v959_v10, %v3241_v32 }
 0x78b   :  { %v2665_v15 = vpop.f32.mrf.mxu0 }
 0x78c   :  { %2840 = vtanh.f32 %v963_v13  ;;  %v2445_v25 = vmul.f32 -1.442695, %v963_v13 }
 0x78d   :  { %2842 = vpow2.f32 %v2443_v19 }
 0x799   :  { %v2841_v17 = vpop.eup %2840 }
 0x79a   :  { %973 = vrot.lane.b32.xlu1 %v2841_v17, %s2980_s3  ;;  %v2843_v21 = vpop.eup %2842 }
 0x79b   :  { %v867_v23 = vadd.f32 1.0, %v2843_v21 }
 0x79d   :  { %2844 = vrcp.f32 %v867_v23 }
 0x79e   :  { %2846 = vpow2.f32 %v2445_v25 }
 0x7aa   :  { %v2845_v16 = vpop.eup %2844 }
 0x7ab   :  { %v2847_v31 = vpop.eup %2846  ;;  %v871_v39 = vmul.f32 %v2845_v16, %v3297_v55 }
 0x7ac   :  { %v967_v33 = vadd.f32 1.0, %v2847_v31 }
 0x7ae   :  { %2848 = vrcp.f32 %v967_v33 }
 0x7bb   :  { %v2849_v32 = vpop.eup %2848 }
 0x7bc   :  { %v971_v43 = vmul.f32 %v2849_v32, %v3302_v59 }
 0x7ee   :  { %v874_v26 = vpop.permute.xlu0 %873 }
 0x7ef   :  { %v876_v28 = vmul.f32 %v2845_v16, %v874_v26 }
 0x7f1   :  { %878 = vrot.lane.b32.xlu0 %v876_v28, %s2981_s1 }
 0x80c   :  { %v974_v35 = vpop.permute.xlu1 %973 }
 0x80d   :  { %v976_v37 = vmul.f32 %v2849_v32, %v974_v35 }
 0x80f   :  { %978 = vrot.lane.b32.xlu1 %v976_v37, %s2981_s1 }
 0x863   :  { %v879_v12 = vpop.permute.xlu0 %878 }
 0x864   :  { %v3343_v40 = vadd.f32 %v879_v12, %v871_v39 }
 0x866   :  { %2850 = vtanh.f32 %v3343_v40 }
 0x873   :  { %v2851_v41 = vpop.eup %2850 }
 0x874   :  { %884 = vrot.lane.b32.xlu0 %v2851_v41, %s2980_s3 }
 0x881   :  { %v979_v44 = vpop.permute.xlu1 %978 }
 0x882   :  { %v3348_v36 = vadd.f32 %v979_v44, %v971_v43 }
 0x884   :  { %2852 = vtanh.f32 %v3348_v36 }
 0x891   :  { %v2853_v51 = vpop.eup %2852 }
 0x892   :  { %984 = vrot.lane.b32.xlu1 %v2853_v51, %s2980_s3 }
 0x8e6   :  { %v885_v52 = vpop.permute.xlu0 %884 }
 0x8e7   :  { %v3352_v53 = vmul.f32 %v2845_v16, %v885_v52 }
 0x8e9   :  { %989 = vrot.lane.b32.xlu0 %v3352_v53, %s2981_s1 }
 0x904   :  { %v985_v54 = vpop.permute.xlu1 %984 }
 0x905   :  { %v3356_v55 = vmul.f32 %v2849_v32, %v985_v54 }
 0x907   :  { %1089 = vrot.lane.b32.xlu1 %v3356_v55, %s2981_s1 }
 0x95b   :  { %v990_v56 = vpop.permute.xlu0 %989 }
 0x95c   :  { %2675 = vmatmul.mubr.msk.f32.vlgmr.msra.gmra.mxu1 %vm249_vm11, %v990_v56 }
 0x95d   :  { %2689 = vmatpush3.msra.mxu1 %v3099_v30  ;;  %2696 = vmatprep.mubr.msk.f32.mxu1 %vm2979_vm10, %v2978_v7 }
 0x95e   :  { %2690 = vmatprep.subr.mxu1 %v2978_v7 }
 0x95f   :  { %2691 = vmatpush3.msra.mxu1 %v3122_v42 }
 0x960   :  { %2692 = vmatprep.subr.mxu1 %v2978_v7 }
 0x961   :  { %2693 = vmatpush3.msra.mxu1 %v3135_v45 }
 0x962   :  { %2694 = vmatprep.subr.mxu1 %v2978_v7 }
 0x963   :  { %2695 = vmatpush3.msra.mxu1 %v3142_v46 }
 0x964   :  { %2710 = vmatprep.subr.mxu1 %v2978_v7 }
 0x979   :  { %v1090_v57 = vpop.permute.xlu1 %1089 }
 0x97a   :  { %2686 = vmatmul.mubr.msk.f32.vlgmr.msra.gmra.mxu0 %vm249_vm11, %v1090_v57 }
 0x97b   :  { %2700 = vmatpush3.msra.mxu0 %v3155_v47  ;;  %2707 = vmatprep.mubr.msk.f32.mxu0 %vm2979_vm10, %v2978_v7 }
 0x97c   :  { %2701 = vmatprep.subr.mxu0 %v2978_v7 }
 0x97d   :  { %2702 = vmatpush3.msra.mxu0 %v3162_v48 }
 0x97e   :  { %2703 = vmatprep.subr.mxu0 %v2978_v7 }
 0x97f   :  { %2704 = vmatpush3.msra.mxu0 %v3168_v49 }
 0x980   :  { %2705 = vmatprep.subr.mxu0 %v2978_v7 }
 0x981   :  { %2706 = vmatpush3.msra.mxu0 %v3176_v50 }
 0x982   :  { %2721 = vmatprep.subr.mxu0 %v2978_v7 }
 0xa1c   :  { %v1059_v58 = vpop.f32.mrf.mxu1 }
 0xa1d   :  { %v1063_v59 = vadd.f32 %v1059_v58, %v3230_v20 }
 0xa1e   :  { %v2676_v60 = vpop.f32.mrf.mxu1 }
 0xa1f   :  { %2854 = vtanh.f32 %v1063_v59  ;;  %v2447_v4 = vmul.f32 -1.442695, %v1063_v59 }
 0xa2c   :  { %v2855_v61 = vpop.eup %2854 }
 0xa2d   :  { %1073 = vrot.lane.b32.xlu0 %v2855_v61, %s2980_s3 }
 0xa3a   :  { %v1159_v63 = vpop.f32.mrf.mxu0 }
 0xa3b   :  { %v1163_v1 = vadd.f32 %v1159_v63, %v3236_v27 }
 0xa3c   :  { %v2687_v2 = vpop.f32.mrf.mxu0 }
 0xa3d   :  { %2856 = vtanh.f32 %v1163_v1  ;;  %v2449_v10 = vmul.f32 -1.442695, %v1163_v1 }
 0xa3e   :  { %2858 = vpow2.f32 %v2447_v4 }
 0xa4a   :  { %v2857_v3 = vpop.eup %2856 }
 0xa4b   :  { %1173 = vrot.lane.b32.xlu1 %v2857_v3, %s2980_s3  ;;  %v2859_v5 = vpop.eup %2858 }
 0xa4c   :  { %v1067_v6 = vadd.f32 1.0, %v2859_v5 }
 0xa4e   :  { %2860 = vrcp.f32 %v1067_v6 }
 0xa4f   :  { %2862 = vpow2.f32 %v2449_v10 }
 0xa5b   :  { %v2861_v20 = vpop.eup %2860 }
 0xa5c   :  { %v2863_v17 = vpop.eup %2862  ;;  %v1071_v25 = vmul.f32 %v2861_v20, %v3343_v40 }
 0xa5d   :  { %v1167_v19 = vadd.f32 1.0, %v2863_v17 }
 0xa5f   :  { %2864 = vrcp.f32 %v1167_v19 }
 0xa6c   :  { %v2865_v27 = vpop.eup %2864 }
 0xa6d   :  { %v1171_v31 = vmul.f32 %v2865_v27, %v3348_v36 }
 0xa9f   :  { %v1074_v13 = vpop.permute.xlu0 %1073 }
 0xaa0   :  { %v1076_v15 = vmul.f32 %v2861_v20, %v1074_v13 }
 0xaa2   :  { %1078 = vrot.lane.b32.xlu0 %v1076_v15, %s2981_s1 }
 0xabd   :  { %v1174_v21 = vpop.permute.xlu1 %1173 }
 0xabe   :  { %v1176_v23 = vmul.f32 %v2865_v27, %v1174_v21 }
 0xac0   :  { %1178 = vrot.lane.b32.xlu1 %v1176_v23, %s2981_s1 }
 0xb14   :  { %v1079_v16 = vpop.permute.xlu0 %1078 }
 0xb15   :  { %v3389_v26 = vadd.f32 %v1079_v16, %v1071_v25 }
 0xb17   :  { %2866 = vtanh.f32 %v3389_v26 }
 0xb24   :  { %v2867_v28 = vpop.eup %2866 }
 0xb25   :  { %1084 = vrot.lane.b32.xlu0 %v2867_v28, %s2980_s3 }
 0xb32   :  { %v1179_v33 = vpop.permute.xlu1 %1178 }
 0xb33   :  { %v3394_v32 = vadd.f32 %v1179_v33, %v1171_v31 }
 0xb35   :  { %2868 = vtanh.f32 %v3394_v32 }
 0xb42   :  { %v2869_v35 = vpop.eup %2868 }
 0xb43   :  { %1184 = vrot.lane.b32.xlu1 %v2869_v35, %s2980_s3 }
 0xb97   :  { %v1085_v37 = vpop.permute.xlu0 %1084 }
 0xb98   :  { %v3398_v39 = vmul.f32 %v2861_v20, %v1085_v37 }
 0xb9a   :  { %1189 = vrot.lane.b32.xlu0 %v3398_v39, %s2981_s1 }
 0xbb5   :  { %v1185_v12 = vpop.permute.xlu1 %1184 }
 0xbb6   :  { %v3402_v40 = vmul.f32 %v2865_v27, %v1185_v12 }
 0xbb8   :  { %1289 = vrot.lane.b32.xlu1 %v3402_v40, %s2981_s1 }
 0xc0c   :  { %v1190_v41 = vpop.permute.xlu0 %1189 }
 0xc0d   :  { %2697 = vmatmul.mubr.msk.f32.vlgmr.msra.gmra.mxu1 %vm249_vm11, %v1190_v41 }
 0xc0e   :  { %2711 = vmatpush3.msra.mxu1 %v3099_v30  ;;  %2718 = vmatprep.mubr.msk.f32.mxu1 %vm2979_vm10, %v2978_v7 }
 0xc0f   :  { %2712 = vmatprep.subr.mxu1 %v2978_v7 }
 0xc10   :  { %2713 = vmatpush3.msra.mxu1 %v3122_v42 }
 0xc11   :  { %2714 = vmatprep.subr.mxu1 %v2978_v7 }
 0xc12   :  { %2715 = vmatpush3.msra.mxu1 %v3135_v45 }
 0xc13   :  { %2716 = vmatprep.subr.mxu1 %v2978_v7 }
 0xc14   :  { %2717 = vmatpush3.msra.mxu1 %v3142_v46 }
 0xc15   :  { %2732 = vmatprep.subr.mxu1 %v2978_v7 }
 0xc2a   :  { %v1290_v43 = vpop.permute.xlu1 %1289 }
 0xc2b   :  { %2708 = vmatmul.mubr.msk.f32.vlgmr.msra.gmra.mxu0 %vm249_vm11, %v1290_v43 }
 0xc2c   :  { %2722 = vmatpush3.msra.mxu0 %v3155_v47  ;;  %2729 = vmatprep.mubr.msk.f32.mxu0 %vm2979_vm10, %v2978_v7 }
 0xc2d   :  { %2723 = vmatprep.subr.mxu0 %v2978_v7 }
 0xc2e   :  { %2724 = vmatpush3.msra.mxu0 %v3162_v48 }
 0xc2f   :  { %2725 = vmatprep.subr.mxu0 %v2978_v7 }
 0xc30   :  { %2726 = vmatpush3.msra.mxu0 %v3168_v49 }
 0xc31   :  { %2727 = vmatprep.subr.mxu0 %v2978_v7 }
 0xc32   :  { %2728 = vmatpush3.msra.mxu0 %v3176_v50 }
 0xc33   :  { %2743 = vmatprep.subr.mxu0 %v2978_v7 }
 0xccd   :  { %v1259_v44 = vpop.f32.mrf.mxu1 }
 0xcce   :  { %v1263_v36 = vadd.f32 %v1259_v44, %v3234_v24 }
 0xccf   :  { %v2698_v51 = vpop.f32.mrf.mxu1 }
 0xcd0   :  { %2870 = vtanh.f32 %v1263_v36  ;;  %v2451_v59 = vmul.f32 -1.442695, %v1263_v36 }
 0xcdd   :  { %v2871_v52 = vpop.eup %2870 }
 0xcde   :  { %1273 = vrot.lane.b32.xlu0 %v2871_v52, %s2980_s3 }
 0xceb   :  { %v1359_v54 = vpop.f32.mrf.mxu0 }
 0xcec   :  { %v1363_v56 = vadd.f32 %v1359_v54, %v3232_v22 }
 0xced   :  { %v2709_v57 = vpop.f32.mrf.mxu0 }
 0xcee   :  { %2872 = vtanh.f32 %v1363_v56  ;;  %v2453_v63 = vmul.f32 -1.442695, %v1363_v56 }
 0xcef   :  { %2874 = vpow2.f32 %v2451_v59 }
 0xcfb   :  { %v2873_v58 = vpop.eup %2872 }
 0xcfc   :  { %1373 = vrot.lane.b32.xlu1 %v2873_v58, %s2980_s3  ;;  %v2875_v60 = vpop.eup %2874 }
 0xcfd   :  { %v1267_v61 = vadd.f32 1.0, %v2875_v60 }
 0xcff   :  { %2876 = vrcp.f32 %v1267_v61 }
 0xd00   :  { %2878 = vpow2.f32 %v2453_v63 }
 0xd0c   :  { %v2877_v24 = vpop.eup %2876 }
 0xd0d   :  { %v2879_v3 = vpop.eup %2878  ;;  %v1271_v10 = vmul.f32 %v2877_v24, %v3389_v26 }
 0xd0e   :  { %v1367_v4 = vadd.f32 1.0, %v2879_v3 }
 0xd10   :  { %2880 = vrcp.f32 %v1367_v4 }
 0xd1d   :  { %v2881_v22 = vpop.eup %2880 }
 0xd1e   :  { %v1371_v17 = vmul.f32 %v2881_v22, %v3394_v32 }
 0xd50   :  { %v1274_v1 = vpop.permute.xlu0 %1273 }
 0xd51   :  { %v1276_v2 = vmul.f32 %v2877_v24, %v1274_v1 }
 0xd53   :  { %1278 = vrot.lane.b32.xlu0 %v1276_v2, %s2981_s1 }
 0xd6e   :  { %v1374_v5 = vpop.permute.xlu1 %1373 }
 0xd6f   :  { %v1376_v6 = vmul.f32 %v2881_v22, %v1374_v5 }
 0xd71   :  { %1378 = vrot.lane.b32.xlu1 %v1376_v6, %s2981_s1 }
 0xdc5   :  { %v1279_v20 = vpop.permute.xlu0 %1278 }
 0xdc6   :  { %v3435_v13 = vadd.f32 %v1279_v20, %v1271_v10  ;;  %v2952_v20 = vld [vmem:[%s3692_s4 + $0x18] sm:$0xff] }
 0xdc8   :  { %2882 = vtanh.f32 %v3435_v13 }
 0xdd5   :  { %v2883_v15 = vpop.eup %2882 }
 0xdd6   :  { %1284 = vrot.lane.b32.xlu0 %v2883_v15, %s2980_s3  ;;  %v2954_v15 = vld [vmem:[%s3692_s4 + $0x8] sm:$0xff] }
 0xde3   :  { %v1379_v19 = vpop.permute.xlu1 %1378 }
 0xde4   :  { %v3440_v27 = vadd.f32 %v1379_v19, %v1371_v17 }
 0xde6   :  { %2884 = vtanh.f32 %v3440_v27 }
 0xdf3   :  { %v2885_v21 = vpop.eup %2884 }
 0xdf4   :  { %1384 = vrot.lane.b32.xlu1 %v2885_v21, %s2980_s3 }
 0xe48   :  { %v1285_v23 = vpop.permute.xlu0 %1284 }
 0xe49   :  { %v3444_v25 = vmul.f32 %v2877_v24, %v1285_v23 }
 0xe4b   :  { %1389 = vrot.lane.b32.xlu0 %v3444_v25, %s2981_s1 }
 0xe66   :  { %v1385_v16 = vpop.permute.xlu1 %1384 }
 0xe67   :  { %v3448_v26 = vmul.f32 %v2881_v22, %v1385_v16 }
 0xe69   :  { %1489 = vrot.lane.b32.xlu1 %v3448_v26, %s2981_s1 }
 0xebd   :  { %v1390_v28 = vpop.permute.xlu0 %1389 }
 0xebe   :  { %2719 = vmatmul.mubr.msk.f32.vlgmr.msra.gmra.mxu1 %vm249_vm11, %v1390_v28 }
 0xebf   :  { %2733 = vmatpush3.msra.mxu1 %v3099_v30  ;;  %2740 = vmatprep.mubr.msk.f32.mxu1 %vm2979_vm10, %v2978_v7 }
 0xec0   :  { %2734 = vmatprep.subr.mxu1 %v2978_v7 }
 0xec1   :  { %2735 = vmatpush3.msra.mxu1 %v3122_v42 }
 0xec2   :  { %2736 = vmatprep.subr.mxu1 %v2978_v7 }
 0xec3   :  { %2737 = vmatpush3.msra.mxu1 %v3135_v45 }
 0xec4   :  { %2738 = vmatprep.subr.mxu1 %v2978_v7 }
 0xec5   :  { %2739 = vmatpush3.msra.mxu1 %v3142_v46 }
 0xec6   :  { %2754 = vmatprep.subr.mxu1 %v2978_v7 }
 0xedb   :  { %v1490_v31 = vpop.permute.xlu1 %1489 }
 0xedc   :  { %2730 = vmatmul.mubr.msk.f32.vlgmr.msra.gmra.mxu0 %vm249_vm11, %v1490_v31 }
 0xedd   :  { %2744 = vmatpush3.msra.mxu0 %v3155_v47  ;;  %2751 = vmatprep.mubr.msk.f32.mxu0 %vm2979_vm10, %v2978_v7 }
 0xede   :  { %2745 = vmatprep.subr.mxu0 %v2978_v7 }
 0xedf   :  { %2746 = vmatpush3.msra.mxu0 %v3162_v48 }
 0xee0   :  { %2747 = vmatprep.subr.mxu0 %v2978_v7 }
 0xee1   :  { %2748 = vmatpush3.msra.mxu0 %v3168_v49 }
 0xee2   :  { %2749 = vmatprep.subr.mxu0 %v2978_v7 }
 0xee3   :  { %2750 = vmatpush3.msra.mxu0 %v3176_v50 }
 0xee4   :  { %2765 = vmatprep.subr.mxu0 %v2978_v7 }
 0xf7e   :  { %v1459_v30 = vpop.f32.mrf.mxu1 }
 0xf7f   :  { %v1463_v42 = vadd.f32 %v1459_v30, %v3239_v29 }
 0xf80   :  { %v2720_v45 = vpop.f32.mrf.mxu1 }
 0xf81   :  { %2886 = vtanh.f32 %v1463_v42  ;;  %v2455_v41 = vmul.f32 -1.442695, %v1463_v42 }
 0xf8e   :  { %v2887_v33 = vpop.eup %2886 }
 0xf8f   :  { %1473 = vrot.lane.b32.xlu0 %v2887_v33, %s2980_s3 }
 0xf9c   :  { %v1559_v32 = vpop.f32.mrf.mxu0 }
 0xf9d   :  { %v1563_v35 = vadd.f32 %v1559_v32, %v3228_v18 }
 0xf9e   :  { %v2731_v37 = vpop.f32.mrf.mxu0 }
 0xf9f   :  { %2888 = vtanh.f32 %v1563_v35  ;;  %v2457_v36 = vmul.f32 -1.442695, %v1563_v35 }
 0xfa0   :  { %2890 = vpow2.f32 %v2455_v41 }
 0xfac   :  { %v2889_v12 = vpop.eup %2888 }
 0xfad   :  { %1573 = vrot.lane.b32.xlu1 %v2889_v12, %s2980_s3  ;;  %v2891_v43 = vpop.eup %2890 }
 0xfae   :  { %v1467_v44 = vadd.f32 1.0, %v2891_v43 }
 0xfb0   :  { %2892 = vrcp.f32 %v1467_v44 }
 0xfb1   :  { %2894 = vpow2.f32 %v2457_v36 }
 0xfbd   :  { %v2893_v29 = vpop.eup %2892 }
 0xfbe   :  { %v2895_v54 = vpop.eup %2894  ;;  %v1471_v59 = vmul.f32 %v2893_v29, %v3435_v13  ;;  %v2953_v13 = vld [vmem:[%s3692_s4 + $0x10] sm:$0xff] }
 0xfbf   :  { %v1567_v56 = vadd.f32 1.0, %v2895_v54 }
 0xfc1   :  { %2896 = vrcp.f32 %v1567_v56 }
 0xfce   :  { %v2897_v18 = vpop.eup %2896 }
 0xfcf   :  { %v1571_v24 = vmul.f32 %v2897_v18, %v3440_v27 }
0x1001   :  { %v1474_v51 = vpop.permute.xlu0 %1473 }
0x1002   :  { %v1476_v52 = vmul.f32 %v2893_v29, %v1474_v51 }
0x1004   :  { %1478 = vrot.lane.b32.xlu0 %v1476_v52, %s2981_s1 }
0x101f   :  { %v1574_v57 = vpop.permute.xlu1 %1573 }
0x1020   :  { %v1576_v58 = vmul.f32 %v2897_v18, %v1574_v57 }
0x1022   :  { %1578 = vrot.lane.b32.xlu1 %v1576_v58, %s2981_s1 }
0x1076   :  { %v1479_v60 = vpop.permute.xlu0 %1478 }
0x1077   :  { %v3481_v61 = vadd.f32 %v1479_v60, %v1471_v59 }
0x1079   :  { %2898 = vtanh.f32 %v3481_v61 }
0x1086   :  { %v2899_v63 = vpop.eup %2898 }
0x1087   :  { %1484 = vrot.lane.b32.xlu0 %v2899_v63, %s2980_s3 }
0x1094   :  { %v1579_v1 = vpop.permute.xlu1 %1578 }
0x1095   :  { %v3486_v2 = vadd.f32 %v1579_v1, %v1571_v24 }
0x1097   :  { %2900 = vtanh.f32 %v3486_v2 }
0x10a4   :  { %v2901_v3 = vpop.eup %2900 }
0x10a5   :  { %1584 = vrot.lane.b32.xlu1 %v2901_v3, %s2980_s3 }
0x10f9   :  { %v1485_v4 = vpop.permute.xlu0 %1484 }
0x10fa   :  { %v3490_v22 = vmul.f32 %v2893_v29, %v1485_v4 }
0x10fc   :  { %1589 = vrot.lane.b32.xlu0 %v3490_v22, %s2981_s1 }
0x1117   :  { %v1585_v5 = vpop.permute.xlu1 %1584 }
0x1118   :  { %v3494_v6 = vmul.f32 %v2897_v18, %v1585_v5 }
0x111a   :  { %1689 = vrot.lane.b32.xlu1 %v3494_v6, %s2981_s1 }
0x116e   :  { %v1590_v10 = vpop.permute.xlu0 %1589 }
0x116f   :  { %2741 = vmatmul.mubr.msk.f32.vlgmr.msra.gmra.mxu1 %vm249_vm11, %v1590_v10 }
0x1170   :  { %2755 = vmatpush3.msra.mxu1 %v2952_v20  ;;  %2762 = vmatprep.mubr.msk.f32.mxu1 %vm2979_vm10, %v2978_v7 }
0x1171   :  { %2756 = vmatprep.subr.mxu1 %v2978_v7 }
0x1172   :  { %2757 = vmatpush3.msra.mxu1 %v2953_v13 }
0x1173   :  { %2758 = vmatprep.subr.mxu1 %v2978_v7 }
0x1174   :  { %2759 = vmatpush3.msra.mxu1 %v2954_v15 }
0x1175   :  { %2760 = vmatprep.subr.mxu1 %v2978_v7 }
0x1176   :  { %2761 = vmatpush3.msra.mxu1 %v3142_v46 }
0x1177   :  { %2776 = vmatprep.subr.mxu1 %v2978_v7 }
0x118c   :  { %v1690_v17 = vpop.permute.xlu1 %1689 }
0x118d   :  { %2752 = vmatmul.mubr.msk.f32.vlgmr.msra.gmra.mxu0 %vm249_vm11, %v1690_v17 }
0x118e   :  { %2766 = vmatpush3.msra.mxu0 %v3155_v47  ;;  %2773 = vmatprep.mubr.msk.f32.mxu0 %vm2979_vm10, %v2978_v7 }
0x118f   :  { %2767 = vmatprep.subr.mxu0 %v2978_v7 }
0x1190   :  { %2768 = vmatpush3.msra.mxu0 %v3162_v48 }
0x1191   :  { %2769 = vmatprep.subr.mxu0 %v2978_v7 }
0x1192   :  { %2770 = vmatpush3.msra.mxu0 %v3168_v49 }
0x1193   :  { %2771 = vmatprep.subr.mxu0 %v2978_v7 }
0x1194   :  { %2772 = vmatpush3.msra.mxu0 %v3176_v50 }
0x1195   :  { %2787 = vmatprep.subr.mxu0 %v2978_v7 }
0x122f   :  { %v1659_v46 = vpop.f32.mrf.mxu1 }
0x1230   :  { %v1663_v47 = vadd.f32 %v1659_v46, %v3243_v34 }
0x1231   :  { %v2742_v19 = vpop.f32.mrf.mxu1 }
0x1232   :  { %2902 = vtanh.f32 %v1663_v47  ;;  %v2459_v16 = vmul.f32 -1.442695, %v1663_v47 }
0x123f   :  { %v2903_v27 = vpop.eup %2902 }
0x1240   :  { %1673 = vrot.lane.b32.xlu0 %v2903_v27, %s2980_s3 }
0x124d   :  { %v1759_v21 = vpop.f32.mrf.mxu0 }
0x124e   :  { %v1763_v48 = vadd.f32 %v1759_v21, %v3224_v14 }
0x124f   :  { %v2753_v23 = vpop.f32.mrf.mxu0 }
0x1250   :  { %2904 = vtanh.f32 %v1763_v48  ;;  %v2461_v31 = vmul.f32 -1.442695, %v1763_v48 }
0x1251   :  { %2906 = vpow2.f32 %v2459_v16 }
0x125d   :  { %v2905_v49 = vpop.eup %2904 }
0x125e   :  { %1773 = vrot.lane.b32.xlu1 %v2905_v49, %s2980_s3  ;;  %v2907_v50 = vpop.eup %2906 }
0x125f   :  { %v1667_v28 = vadd.f32 1.0, %v2907_v50 }
0x1261   :  { %2908 = vrcp.f32 %v1667_v28 }
0x1262   :  { %2910 = vpow2.f32 %v2461_v31 }
0x126e   :  { %v2909_v34 = vpop.eup %2908 }
0x126f   :  { %v2911_v45 = vpop.eup %2910  ;;  %v1671_v37 = vmul.f32 %v2909_v34, %v3481_v61 }
0x1270   :  { %v1767_v33 = vadd.f32 1.0, %v2911_v45 }
0x1272   :  { %2912 = vrcp.f32 %v1767_v33 }
0x127f   :  { %v2913_v14 = vpop.eup %2912 }
0x1280   :  { %v1771_v44 = vmul.f32 %v2913_v14, %v3486_v2 }
0x12b2   :  { %v1674_v30 = vpop.permute.xlu0 %1673 }
0x12b3   :  { %v1676_v42 = vmul.f32 %v2909_v34, %v1674_v30 }
0x12b5   :  { %1678 = vrot.lane.b32.xlu0 %v1676_v42, %s2981_s1 }
0x12d0   :  { %v1774_v32 = vpop.permute.xlu1 %1773 }
0x12d1   :  { %v1776_v35 = vmul.f32 %v2913_v14, %v1774_v32 }
0x12d3   :  { %1778 = vrot.lane.b32.xlu1 %v1776_v35, %s2981_s1 }
0x1327   :  { %v1679_v12 = vpop.permute.xlu0 %1678 }
0x1328   :  { %v1681_v41 = vadd.f32 %v1679_v12, %v1671_v37 }
0x132a   :  { %2914 = vtanh.f32 %v1681_v41 }
0x1337   :  { %v2915_v43 = vpop.eup %2914 }
0x1338   :  { %1684 = vrot.lane.b32.xlu0 %v2915_v43, %s2980_s3 }
0x1345   :  { %v1779_v36 = vpop.permute.xlu1 %1778 }
0x1346   :  { %v1781_v29 = vadd.f32 %v1779_v36, %v1771_v44 }
0x1348   :  { %2916 = vtanh.f32 %v1781_v29 }
0x1355   :  { %v2917_v51 = vpop.eup %2916 }
0x1356   :  { %1784 = vrot.lane.b32.xlu1 %v2917_v51, %s2980_s3 }
0x13aa   :  { %v1685_v52 = vpop.permute.xlu0 %1684 }
0x13ab   :  { %v3536_v54 = vmul.f32 %v2909_v34, %v1685_v52 }
0x13ad   :  { %1789 = vrot.lane.b32.xlu0 %v3536_v54, %s2981_s1 }
0x13c8   :  { %v1785_v56 = vpop.permute.xlu1 %1784 }
0x13c9   :  { %v3540_v18 = vmul.f32 %v2913_v14, %v1785_v56 }
0x13cb   :  { %1889 = vrot.lane.b32.xlu1 %v3540_v18, %s2981_s1 }
0x141f   :  { %v1790_v57 = vpop.permute.xlu0 %1789 }
0x1420   :  { %2763 = vmatmul.mubr.msk.f32.vlgmr.msra.gmra.mxu1 %vm249_vm11, %v1790_v57 }
0x1421   :  { %2784 = vmatprep.mubr.msk.f32.mxu1 %vm2979_vm10, %v2978_v7 }
0x143d   :  { %v1890_v58 = vpop.permute.xlu1 %1889 }
0x143e   :  { %2774 = vmatmul.mubr.msk.f32.vlgmr.msra.gmra.mxu0 %vm249_vm11, %v1890_v58 }
0x143f   :  { %2795 = vmatprep.mubr.msk.f32.mxu0 %vm2979_vm10, %v2978_v7 }
0x14e0   :  { %v1859_v59 = vpop.f32.mrf.mxu1 }
0x14e1   :  { %v1863_v60 = vadd.f32 %v1859_v59, %v3247_v38 }
0x14e2   :  { %v2764_v61 = vpop.f32.mrf.mxu1 }
0x14e3   :  { %2918 = vtanh.f32 %v1863_v60  ;;  %v2463_v4 = vmul.f32 -1.442695, %v1863_v60 }
0x14f0   :  { %v2919_v63 = vpop.eup %2918 }
0x14f1   :  { %1873 = vrot.lane.b32.xlu0 %v2919_v63, %s2980_s3 }
0x14fe   :  { %v1959_v24 = vpop.f32.mrf.mxu0 }
0x14ff   :  { %v1963_v1 = vadd.f32 %v1959_v24, %v3220_v9 }
0x1500   :  { %v2775_v2 = vpop.f32.mrf.mxu0 }
0x1501   :  { %2920 = vtanh.f32 %v1963_v1  ;;  %v2465_v20 = vmul.f32 -1.442695, %v1963_v1 }
0x1502   :  { %2922 = vpow2.f32 %v2463_v4 }
0x150e   :  { %v2921_v3 = vpop.eup %2920 }
0x150f   :  { %1973 = vrot.lane.b32.xlu1 %v2921_v3, %s2980_s3  ;;  %v2923_v5 = vpop.eup %2922 }
0x1510   :  { %v1867_v10 = vadd.f32 1.0, %v2923_v5 }
0x1512   :  { %2924 = vrcp.f32 %v1867_v10 }
0x1513   :  { %2926 = vpow2.f32 %v2465_v20 }
0x151f   :  { %v2925_v38 = vpop.eup %2924 }
0x1520   :  { %v2927_v17 = vpop.eup %2926  ;;  %v1871_v27 = vmul.f32 %v2925_v38, %v1681_v41 }
0x1521   :  { %v1967_v46 = vadd.f32 1.0, %v2927_v17 }
0x1523   :  { %2928 = vrcp.f32 %v1967_v46 }
0x1530   :  { %v2929_v9 = vpop.eup %2928 }
0x1531   :  { %v1971_v49 = vmul.f32 %v2929_v9, %v1781_v29 }
0x1563   :  { %v1874_v13 = vpop.permute.xlu0 %1873 }
0x1564   :  { %v1876_v15 = vmul.f32 %v2925_v38, %v1874_v13 }
0x1566   :  { %1878 = vrot.lane.b32.xlu0 %v1876_v15, %s2981_s1 }
0x1581   :  { %v1974_v47 = vpop.permute.xlu1 %1973 }
0x1582   :  { %v1976_v19 = vmul.f32 %v2929_v9, %v1974_v47 }
0x1584   :  { %1978 = vrot.lane.b32.xlu1 %v1976_v19, %s2981_s1 }
0x15d8   :  { %v1879_v21 = vpop.permute.xlu0 %1878 }
0x15d9   :  { %v1881_v48 = vadd.f32 %v1879_v21, %v1871_v27 }
0x15db   :  { %2930 = vtanh.f32 %v1881_v48 }
0x15e8   :  { %v2931_v23 = vpop.eup %2930 }
0x15e9   :  { %1884 = vrot.lane.b32.xlu0 %v2931_v23, %s2980_s3 }
0x15f6   :  { %v1979_v16 = vpop.permute.xlu1 %1978 }
0x15f7   :  { %v1981_v50 = vadd.f32 %v1979_v16, %v1971_v49 }
0x15f9   :  { %2932 = vtanh.f32 %v1981_v50 }
0x1606   :  { %v2933_v28 = vpop.eup %2932 }
0x1607   :  { %1984 = vrot.lane.b32.xlu1 %v2933_v28, %s2980_s3 }
0x165b   :  { %v1885_v31 = vpop.permute.xlu0 %1884 }
0x165c   :  { %v3558_v34 = vmul.f32 %v2925_v38, %v1885_v31 }
0x165e   :  { %v1995_v42 = vrot.slane %v3558_v34, 1 }
0x1679   :  { %v1985_v30 = vpop.permute.xlu1 %1984 }
0x167a   :  { %v3561_v45 = vmul.f32 %v2929_v9, %v1985_v30 }
0x167c   :  { %v1997_v33 = vsel %vm1991_vm12, %v1995_v42, %v3561_v45  ;;  %v1989_v37 = vrot.slane %v3561_v45, 7 }
0x167d   :  { %v1998_v14 = vsel %vm120_vm0, %v1997_v33, 0.0 }
0x167e   :  { %v2064_v32 = vmul.f32 %v1998_v14, %v3540_v18  ;;  %v2063_v35 = vmul.f32 %v1998_v14, %v3561_v45  ;;  %v2066_v12 = vmul.f32 %v1998_v14, %v3448_v26  ;;  %v2065_v41 = vmul.f32 %v1998_v14, %v3494_v6 }
0x167f   :  { %v1992_v43 = vsel %vm1991_vm12, %v3558_v34, %v1989_v37  ;;  %v2068_v44 = vmul.f32 %v1998_v14, %v3356_v55  ;;  %v2067_v36 = vmul.f32 %v1998_v14, %v3402_v40  ;;  %v2070_v63 = vmul.f32 %v1998_v14, %v3264_v11 }
0x1680   :  { %2081 = vrot.lane.b32.xlu1 %v2064_v32, %s2981_s1  ;;  %2079 = vrot.lane.b32.xlu0 %v2063_v35, %s2981_s1  ;;  %v1993_v29 = vsel %vm120_vm0, %v1992_v43, 0.0  ;;  %v2069_v24 = vmul.f32 %v1998_v14, %v3310_v0  ;;  %v2232_v43 = vld [vmem:[%s3694_s6 + $0x18] sm:$0xff] }
0x1681   :  { %v2000_v51 = vmul.f32 %v1993_v29, %v3306_v62  ;;  %v1999_v52 = vmul.f32 %v1993_v29, %v3260_v8  ;;  %v2002_v56 = vmul.f32 %v1993_v29, %v3398_v39  ;;  %v2001_v57 = vmul.f32 %v1993_v29, %v3352_v53  ;;  %2788 = vmatpush3.msra.mxu0 %v2232_v43 }
0x1682   :  { %v2004_v58 = vmul.f32 %v1993_v29, %v3490_v22  ;;  %v2003_v59 = vmul.f32 %v1993_v29, %v3444_v25  ;;  %v2006_v60 = vmul.f32 %v1993_v29, %v3558_v34  ;;  %v2005_v61 = vmul.f32 %v1993_v29, %v3536_v54  ;;  %2789 = vmatprep.subr.mxu0 %v2978_v7  ;;  %v2234_v29 = vld [vmem:[%s3694_s6 + $0x28] sm:$0xff] }
0x1684   :  { %2085 = vrot.lane.b32.xlu1 %v2066_v12, %s2981_s1  ;;  %2083 = vrot.lane.b32.xlu0 %v2065_v41, %s2981_s1  ;;  %v2236_v41 = vld [vmem:[%s3694_s6 + $0x38] sm:$0xff] }
0x1685   :  { %2777 = vmatpush3.msra.mxu1 %v2236_v41 }
0x1686   :  { %2778 = vmatprep.subr.mxu1 %v2978_v7 }
0x1688   :  { %2089 = vrot.lane.b32.xlu1 %v2068_v44, %s2981_s1  ;;  %2087 = vrot.lane.b32.xlu0 %v2067_v36, %s2981_s1  ;;  %v2235_v44 = vld [vmem:[%s3694_s6 + $0x30] sm:$0xff] }
0x1689   :  { %v2231_v36 = vld [vmem:[%s3694_s6 + $0x10] sm:$0xff]  ;;  %2779 = vmatpush3.msra.mxu1 %v2235_v44 }
0x168a   :  { %2790 = vmatpush3.msra.mxu0 %v2231_v36  ;;  %2780 = vmatprep.subr.mxu1 %v2978_v7 }
0x168b   :  { %2791 = vmatprep.subr.mxu0 %v2978_v7  ;;  %2781 = vmatpush3.msra.mxu1 %v2234_v29 }
0x168c   :  { %2017 = vrot.lane.b32.xlu1 %v2000_v51, %s2981_s1  ;;  %2015 = vrot.lane.b32.xlu0 %v1999_v52, %s2981_s1  ;;  %v2230_v51 = vld [vmem:[%s3694_s6 + $0x8] sm:$0xff]  ;;  %v2233_v52 = vld [vmem:[%s3694_s6 + $0x20] sm:$0xff] }
0x168d   :  { %2792 = vmatpush3.msra.mxu0 %v2230_v51  ;;  %2782 = vmatprep.subr.mxu1 %v2978_v7 }
0x168e   :  { %2793 = vmatprep.subr.mxu0 %v2978_v7  ;;  %2783 = vmatpush3.msra.mxu1 %v2233_v52 }
0x1690   :  { %2021 = vrot.lane.b32.xlu1 %v2002_v56, %s2981_s1  ;;  %2019 = vrot.lane.b32.xlu0 %v2001_v57, %s2981_s1  ;;  %v2229_v56 = vld [vmem:[%s3694_s6] sm:$0xff] }
0x1691   :  { %2794 = vmatpush3.msra.mxu0 %v2229_v56 }
0x1694   :  { %2025 = vrot.lane.b32.xlu1 %v2004_v58, %s2981_s1  ;;  %2023 = vrot.lane.b32.xlu0 %v2003_v59, %s2981_s1 }
0x1698   :  { %2029 = vrot.lane.b32.xlu1 %v2006_v60, %s2981_s1  ;;  %2027 = vrot.lane.b32.xlu0 %v2005_v61, %s2981_s1 }
0x169c   :  { %2093 = vrot.lane.b32.xlu1 %v2070_v63, %s2981_s1  ;;  %2091 = vrot.lane.b32.xlu0 %v2069_v24, %s2981_s1 }
0x16f2   :  { %v2082_v1 = vpop.permute.xlu1 %2081  ;;  %v2080_v2 = vpop.permute.xlu0 %2079 }
0x16f3   :  { %v2103_v3 = vsel %vm249_vm11, %v2080_v2, 0.0  ;;  %v2106_v4 = vsel %vm249_vm11, %v2082_v1, 0.0 }
0x16f4   :  { %2104 = vadd.xlane.f32.xlu1 %v2103_v3  ;;  %2107 = vadd.xlane.f32.xlu0 %v2106_v4 }
0x16f6   :  { %v2086_v5 = vpop.permute.xlu1 %2085  ;;  %v2084_v10 = vpop.permute.xlu0 %2083 }
0x16f7   :  { %v2109_v20 = vsel %vm249_vm11, %v2084_v10, 0.0  ;;  %v2112_v38 = vsel %vm249_vm11, %v2086_v5, 0.0 }
0x16f8   :  { %2110 = vadd.xlane.f32.xlu1 %v2109_v20  ;;  %2113 = vadd.xlane.f32.xlu0 %v2112_v38 }
0x16fa   :  { %v2090_v13 = vpop.permute.xlu1 %2089  ;;  %v2088_v15 = vpop.permute.xlu0 %2087 }
0x16fb   :  { %v2115_v17 = vsel %vm249_vm11, %v2088_v15, 0.0  ;;  %v2118_v46 = vsel %vm249_vm11, %v2090_v13, 0.0 }
0x16fc   :  { %2116 = vadd.xlane.f32.xlu1 %v2115_v17  ;;  %2119 = vadd.xlane.f32.xlu0 %v2118_v46 }
0x16fe   :  { %v2018_v9 = vpop.permute.xlu1 %2017  ;;  %v2016_v47 = vpop.permute.xlu0 %2015 }
0x16ff   :  { %v2042_v19 = vsel %vm249_vm11, %v2018_v9, 0.0  ;;  %v2039_v27 = vsel %vm249_vm11, %v2016_v47, 0.0 }
0x1700   :  { %2043 = vadd.xlane.f32.xlu1 %v2042_v19  ;;  %2040 = vadd.xlane.f32.xlu0 %v2039_v27 }
0x1702   :  { %v2022_v21 = vpop.permute.xlu1 %2021  ;;  %v2020_v48 = vpop.permute.xlu0 %2019 }
0x1703   :  { %v2045_v23 = vsel %vm249_vm11, %v2020_v48, 0.0  ;;  %v2048_v50 = vsel %vm249_vm11, %v2022_v21, 0.0 }
0x1704   :  { %2046 = vadd.xlane.f32.xlu0 %v2045_v23 }
0x1706   :  { %v2026_v49 = vpop.permute.xlu1 %2025  ;;  %v2024_v16 = vpop.permute.xlu0 %2023 }
0x1707   :  { %v2051_v28 = vsel %vm249_vm11, %v2024_v16, 0.0  ;;  %v2054_v42 = vsel %vm249_vm11, %v2026_v49, 0.0 }
0x1708   :  { %2049 = vadd.xlane.f32.xlu0 %v2048_v50  ;;  %2052 = vadd.xlane.f32.xlu1 %v2051_v28 }
0x170a   :  { %v2030_v31 = vpop.permute.xlu1 %2029  ;;  %v2028_v30 = vpop.permute.xlu0 %2027 }
0x170b   :  { %v2057_v33 = vsel %vm249_vm11, %v2028_v30, 0.0  ;;  %v2060_v32 = vsel %vm249_vm11, %v2030_v31, 0.0 }
0x170c   :  { %2055 = vadd.xlane.f32.xlu0 %v2054_v42  ;;  %2058 = vadd.xlane.f32.xlu1 %v2057_v33 }
0x170e   :  { %v2092_v14 = vpop.permute.xlu0 %2091  ;;  %v2094_v37 = vpop.permute.xlu1 %2093 }
0x170f   :  { %v2121_v35 = vsel %vm249_vm11, %v2092_v14, 0.0  ;;  %v2124_v12 = vsel %vm249_vm11, %v2094_v37, 0.0 }
0x1710   :  { %2061 = vadd.xlane.f32.xlu0 %v2060_v32  ;;  %2122 = vadd.xlane.f32.xlu1 %v2121_v35 }
0x1714   :  { %2125 = vadd.xlane.f32.xlu0 %v2124_v12 }
0x177d   :  { %v2105_v57 = vpop.xlane.xlu1 %2104  ;;  %v2108_v58 = vpop.xlane.xlu0 %2107 }
0x1781   :  { %v2111_v59 = vpop.xlane.xlu1 %2110  ;;  %v2114_v60 = vpop.xlane.xlu0 %2113 }
0x1785   :  { %v2120_v61 = vpop.xlane.xlu0 %2119  ;;  %v2117_v63 = vpop.xlane.xlu1 %2116 }
0x1789   :  { %v2041_v24 = vpop.xlane.xlu0 %2040  ;;  %v2044_v1 = vpop.xlane.xlu1 %2043 }
0x178a   :  { %v2128_v15 = vadd.f32 %v2108_v58, %v2044_v1  ;;  %v2127_v46 = vadd.f32 %v2105_v57, %v2041_v24 }
0x178d   :  { %v2047_v2 = vpop.xlane.xlu0 %2046 }
0x178e   :  { %v2129_v47 = vadd.f32 %v2111_v59, %v2047_v2 }
0x1791   :  { %v2053_v3 = vpop.xlane.xlu1 %2052  ;;  %v2050_v4 = vpop.xlane.xlu0 %2049 }
0x1792   :  { %v2131_v7 = vadd.f32 %v2117_v63, %v2053_v3  ;;  %v2130_v19 = vadd.f32 %v2114_v60, %v2050_v4 }
0x1794   :  { %v2135_v48 = vmax.f32 %v2127_v46, %v2131_v7 }
0x1795   :  { %v2059_v5 = vpop.xlane.xlu1 %2058  ;;  %v2056_v10 = vpop.xlane.xlu0 %2055 }
0x1796   :  { %v2132_v13 = vadd.f32 %v2120_v61, %v2056_v10 }
0x1798   :  { %v2136_v27 = vmax.f32 %v2128_v15, %v2132_v13 }
0x1799   :  { %v2123_v20 = vpop.xlane.xlu1 %2122  ;;  %v2062_v38 = vpop.xlane.xlu0 %2061 }
0x179a   :  { %v2133_v17 = vadd.f32 %v2123_v20, %v2059_v5  ;;  %v2139_v16 = vmax.f32 %v2135_v48, %v2136_v27 }
0x179c   :  { %v2137_v23 = vmax.f32 %v2129_v47, %v2133_v17 }
0x179d   :  { %v2126_v9 = vpop.xlane.xlu0 %2125 }
0x179e   :  { %v2134_v21 = vadd.f32 %v2126_v9, %v2062_v38 }
0x17a0   :  { %v2138_v49 = vmax.f32 %v2130_v19, %v2134_v21 }
0x17a2   :  { %v2140_v50 = vmax.f32 %v2137_v23, %v2138_v49 }
0x17a4   :  { %v2141_v28 = vmax.f32 %v2139_v16, %v2140_v50 }
0x17a6   :  { %v2142_v31 = vsub.f32 %v2127_v46, %v2141_v28  ;;  %v2143_v30 = vsub.f32 %v2128_v15, %v2141_v28  ;;  %v2144_v42 = vsub.f32 %v2129_v47, %v2141_v28  ;;  %v2145_v33 = vsub.f32 %v2130_v19, %v2141_v28 }
0x17a7   :  { %v2146_v35 = vsub.f32 %v2131_v7, %v2141_v28  ;;  %v2147_v12 = vsub.f32 %v2132_v13, %v2141_v28  ;;  %v2148_v43 = vsub.f32 %v2133_v17, %v2141_v28  ;;  %v2149_v36 = vsub.f32 %v2134_v21, %v2141_v28 }
0x17a8   :  { %v2150_v14 = vmul.f32 1.442695, %v2142_v31  ;;  %v2152_v32 = vmul.f32 1.442695, %v2143_v30  ;;  %v2154_v37 = vmul.f32 1.442695, %v2144_v42 }
0x17a9   :  { %v2156_v41 = vmul.f32 1.442695, %v2145_v33  ;;  %v2158_v44 = vmul.f32 1.442695, %v2146_v35  ;;  %v2160_v29 = vmul.f32 1.442695, %v2147_v12 }
0x17aa   :  { %2934 = vpow2.f32 %v2150_v14  ;;  %v2162_v51 = vmul.f32 1.442695, %v2148_v43  ;;  %v2164_v52 = vmul.f32 1.442695, %v2149_v36 }
0x17ab   :  { %2936 = vpow2.f32 %v2152_v32 }
0x17ac   :  { %2938 = vpow2.f32 %v2154_v37 }
0x17ad   :  { %2940 = vpow2.f32 %v2156_v41 }
0x17ae   :  { %2942 = vpow2.f32 %v2158_v44 }
0x17af   :  { %2944 = vpow2.f32 %v2160_v29 }
0x17b0   :  { %2946 = vpow2.f32 %v2162_v51 }
0x17b1   :  { %2948 = vpow2.f32 %v2164_v52 }
0x17b7   :  { %v2935_v56 = vpop.eup %2934 }
0x17b8   :  { %v2937_v57 = vpop.eup %2936 }
0x17b9   :  { %v2166_v58 = vadd.f32 %v2937_v57, %v2935_v56  ;;  %v2939_v59 = vpop.eup %2938 }
0x17ba   :  { %v2941_v61 = vpop.eup %2940 }
0x17bb   :  { %v2167_v60 = vadd.f32 %v2939_v59, %v2166_v58  ;;  %v2943_v24 = vpop.eup %2942 }
0x17bc   :  { %v2945_v2 = vpop.eup %2944 }
0x17bd   :  { %v2168_v63 = vadd.f32 %v2941_v61, %v2167_v60  ;;  %v2947_v4 = vpop.eup %2946 }
0x17be   :  { %v2949_v10 = vpop.eup %2948 }
0x17bf   :  { %v2169_v1 = vadd.f32 %v2943_v24, %v2168_v63 }
0x17c1   :  { %v2170_v3 = vadd.f32 %v2945_v2, %v2169_v1 }
0x17c3   :  { %v2171_v5 = vadd.f32 %v2947_v4, %v2170_v3 }
0x17c5   :  { %v2172_v20 = vadd.f32 %v2949_v10, %v2171_v5 }
0x17c7   :  { %2950 = vrcp.f32 %v2172_v20 }
0x17d4   :  { %v2951_v38 = vpop.eup %2950 }
0x17d5   :  { %v2174_v13 = vmul.f32 %v2951_v38, %v2935_v56  ;;  %v2175_v15 = vmul.f32 %v2951_v38, %v2937_v57  ;;  %v2176_v7 = vmul.f32 %v2951_v38, %v2939_v59  ;;  %v2177_v17 = vmul.f32 %v2951_v38, %v2941_v61 }
0x17d6   :  { %v2178_v46 = vmul.f32 %v2951_v38, %v2943_v24  ;;  %v2179_v27 = vmul.f32 %v2951_v38, %v2945_v2  ;;  %v2180_v49 = vmul.f32 %v2951_v38, %v2947_v4  ;;  %v2468_v4 = vld [vmem:[%s3695_s7] ss:$0 sm:$0xff] }
0x17d7   :  { %v2206_v9 = vmul.f32 %v2174_v13, %v3561_v45  ;;  %v2207_v47 = vmul.f32 %v2175_v15, %v3540_v18  ;;  %v2208_v19 = vmul.f32 %v2176_v7, %v3494_v6  ;;  %v2209_v21 = vmul.f32 %v2177_v17, %v3448_v26 }
0x17d8   :  { %v2210_v16 = vmul.f32 %v2178_v46, %v3402_v40  ;;  %v2182_v31 = vmul.f32 %v2174_v13, %v3260_v8  ;;  %v2183_v45 = vmul.f32 %v2175_v15, %v3306_v62  ;;  %v2184_v18 = vmul.f32 %v2176_v7, %v3352_v53 }
0x17d9   :  { %v2214_v48 = vsel %vm2190_vm13, %v2206_v9, 0.0  ;;  %v2215_v23 = vsel %vm2190_vm13, %v2207_v47, 0.0  ;;  %v2217_v28 = vsel %vm2190_vm13, %v2208_v19, 0.0  ;;  %v2181_v6 = vmul.f32 %v2951_v38, %v2949_v10 }
0x17da   :  { %v2216_v50 = vadd.f32 %v2215_v23, %v2214_v48  ;;  %v2211_v30 = vmul.f32 %v2179_v27, %v3356_v55  ;;  %v2219_v42 = vsel %vm2190_vm13, %v2209_v21, 0.0  ;;  %v2185_v33 = vmul.f32 %v2177_v17, %v3398_v39 }
0x17db   :  { %v2191_v14 = vsel %vm2190_vm13, %v2182_v31, 0.0  ;;  %v2192_v40 = vsel %vm2190_vm13, %v2183_v45, 0.0  ;;  %v2212_v8 = vmul.f32 %v2180_v49, %v3310_v0  ;;  %v2221_v62 = vsel %vm2190_vm13, %v2210_v16, 0.0 }
0x17dc   :  { %v2218_v26 = vadd.f32 %v2217_v28, %v2216_v50  ;;  %v2193_v35 = vadd.f32 %v2192_v40, %v2191_v14  ;;  %v2186_v53 = vmul.f32 %v2178_v46, %v3444_v25  ;;  %v2194_v37 = vsel %vm2190_vm13, %v2184_v18, 0.0 }
0x17dd   :  { %v2213_v41 = vmul.f32 %v2181_v6, %v3264_v11  ;;  %v2223_v39 = vsel %vm2190_vm13, %v2211_v30, 0.0  ;;  %v2187_v43 = vmul.f32 %v2179_v27, %v3490_v22  ;;  %v2196_v44 = vsel %vm2190_vm13, %v2185_v33, 0.0 }
0x17de   :  { %v2220_v32 = vadd.f32 %v2219_v42, %v2218_v26  ;;  %v2195_v12 = vadd.f32 %v2194_v37, %v2193_v35  ;;  %v2225_v0 = vsel %vm2190_vm13, %v2212_v8, 0.0  ;;  %v2188_v51 = vmul.f32 %v2180_v49, %v3536_v54 }
0x17df   :  { %v2198_v25 = vsel %vm2190_vm13, %v2186_v53, 0.0  ;;  %v2227_v57 = vsel %vm2190_vm13, %v2213_v41, 0.0  ;;  %v2189_v11 = vmul.f32 %v2181_v6, %v3558_v34  ;;  %v2200_v58 = vsel %vm2190_vm13, %v2187_v43, 0.0 }
0x17e0   :  { %v2222_v55 = vadd.f32 %v2221_v62, %v2220_v32  ;;  %v2197_v29 = vadd.f32 %v2196_v44, %v2195_v12  ;;  %v2202_v60 = vsel %vm2190_vm13, %v2188_v51, 0.0 }
0x17e1   :  { %v2204_v63 = vsel %vm2190_vm13, %v2189_v11, 0.0 }
0x17e2   :  { %v2224_v36 = vadd.f32 %v2223_v39, %v2222_v55  ;;  %v2199_v56 = vadd.f32 %v2198_v25, %v2197_v29 }
0x17e4   :  { %v2226_v52 = vadd.f32 %v2225_v0, %v2224_v36  ;;  %v2201_v22 = vadd.f32 %v2200_v58, %v2199_v56 }
0x17e6   :  { %v2228_v59 = vadd.f32 %v2227_v57, %v2226_v52  ;;  %v2203_v61 = vadd.f32 %v2202_v60, %v2201_v22 }
0x17e8   :  { %2238 = vrot.lane.b32.xlu1 %v2228_v59, %s2981_s1  ;;  %v2205_v54 = vadd.f32 %v2204_v63, %v2203_v61 }
0x17ea   :  { %2313 = vrot.lane.b32.xlu0 %v2205_v54, %s2981_s1 }
0x185a   :  { %v2239_v24 = vpop.permute.xlu1 %2238 }
0x185b   :  { %2785 = vmatmul.mubr.msk.f32.vlgmr.msra.gmra.mxu1 %vm249_vm11, %v2239_v24 }
0x185c   :  { %v2314_v1 = vpop.permute.xlu0 %2313 }
0x185d   :  { %2796 = vmatmul.mubr.msk.f32.vlgmr.msra.gmra.mxu0 %vm249_vm11, %v2314_v1 }
0x191b   :  { %v2308_v34 = vpop.f32.mrf.mxu1 }
0x191d   :  { %v2786_v2 = vpop.f32.mrf.mxu1  ;;  %v2383_v3 = vpop.f32.mrf.mxu0 }
0x191e   :  { %v2384_v5 = vadd.f32 %v2383_v3, %v2308_v34 }
0x191f   :  { %v2797_v10 = vpop.f32.mrf.mxu0 }
0x1920   :  { %v2394_v20 = vadd.f32 %v2468_v4, %v2384_v5 }
0x1922   :  { %2396 = vst.msk [vmem:[#allocation2] sm:$0x3] %vm2395_vm14, %v2394_v20 }
0x1923   :  { %2966 = shalt.err (!%p2963_p4)
}
0x1924   :  { %2406 = dma.vmem_to_hbm [thread:$0]  %s2404_s5, 32, %s3696_s8, [#allocation3]  }
0x1925   :  { %2975 = dma.done.wait [#allocation3], 32  }
0x1926   :  { %2976 = vsyncadd [#allocation3], 4294967264 }
0x1927   :  { %2410 = vsyncpa [#allocation3], 1 }

</bundles_post_ra>
